<compile_context>
chip_gen: v7x
topology: tpu7x:2x2x1
jax: 0.10.0
libtpu: 0.0.40
codegen_flags: <defaults>
</compile_context>

<pallas_src>
import functools

import jax
import jax.numpy as jnp
from jax import lax
from jax.experimental import pallas as pl
from jax.experimental.pallas import tpu as pltpu

LANE = 128                       # lane width: channel dims padded to a multiple of this
SUBLANE = 16                     # row-tile alignment (covers bf16 (16,128) packing)
TM_MAX = 512                     # max rows per tile
_VMEM_LIMIT = 32 * 1024 * 1024   # explicit scoped-VMEM budget, safe on v5e/v6e/v7x
_VMEM_BUDGET = 28 * 1024 * 1024  # what the tile chooser targets (leaves headroom)
REF_PRECISION = jax.lax.Precision.HIGHEST   # reference only; kernels use native bf16 MXU


def _round_up(x, m):
    return (x + m - 1) // m * m


def _halve_tile(tm):
    return max(SUBLANE, _round_up(tm // 2, SUBLANE))


def _base_tile_m(m, tm_max=TM_MAX):
    return _round_up(m, SUBLANE) if m <= tm_max else tm_max


def _choose_tile_m_elem(m, c, tm_max=TM_MAX):
    """Row tile for elementwise passes (f32 in, bf16 out, double buffered)."""
    tm = _base_tile_m(m, tm_max)
    while tm > SUBLANE and 2 * tm * c * (4 + 2) + (1 << 20) > _VMEM_BUDGET:
        tm = _halve_tile(tm)
    return tm


def _choose_tile_m_matmul(m, k, cout, tm_max=TM_MAX):
    """Row tile for folded-tap matmuls.

    Budgets: double-buffered bf16 taps + resident bf16 weights (counted twice,
    conservatively) + double-buffered f32 outputs + a residual-sized operand.
    """
    tm = _base_tile_m(m, tm_max)

    def vmem_need(t):
        taps = 2 * t * k * 2
        wts = 2 * k * cout * 2
        outs = 2 * t * cout * 4
        res = 2 * t * cout * 4
        return taps + wts + outs + res + (1 << 20)

    while tm > SUBLANE and vmem_need(tm) > _VMEM_BUDGET:
        tm = _halve_tile(tm)
    return tm


def _pad_axis(x, axis, target):
    pad = target - x.shape[axis]
    if pad == 0:
        return x
    widths = [(0, 0)] * x.ndim
    widths[axis] = (0, pad)
    return jnp.pad(x, widths)


def _mosaic_params():
    return pltpu.CompilerParams(
        dimension_semantics=("parallel",),      # megacore-shard M tiles
        vmem_limit_bytes=_VMEM_LIMIT)


# ------------- Kernel 1: per-tile channel partial stats (sum, sum of squares) -------------
def _stats_kernel(x_ref, stats_ref):
    x = x_ref[...].astype(jnp.float32)
    s = jnp.sum(x, axis=0, keepdims=True)             # (1, C)
    ss = jnp.sum(x * x, axis=0, keepdims=True)        # (1, C)
    stats_ref[...] = jnp.concatenate([s, ss], axis=0)[None]   # (1, 2, C)


def channel_partial_stats(x_flat, tm):
    mp, c = x_flat.shape
    nt = mp // tm
    return pl.pallas_call(
        _stats_kernel,
        out_shape=jax.ShapeDtypeStruct((nt, 2, c), jnp.float32),
        grid=(nt,),
        in_specs=[pl.BlockSpec((tm, c), lambda i: (i, 0))],
        out_specs=pl.BlockSpec((1, 2, c), lambda i: (i, 0, 0)),
        compiler_params=_mosaic_params(),
    )(x_flat)


# --------------------- Kernel 2: fused affine (BN scale/shift) + ReLU ---------------------
def _affine_relu_kernel(x_ref, scale_ref, shift_ref, o_ref):
    x = x_ref[...].astype(jnp.float32)                 # elementwise math in f32 (v5e guard)
    y = x * scale_ref[...] + shift_ref[...]
    o_ref[...] = jnp.maximum(y, 0.0).astype(o_ref.dtype)


def affine_relu(x_flat, scale, shift, tm, out_dtype):
    mp, c = x_flat.shape
    nt = mp // tm
    return pl.pallas_call(
        _affine_relu_kernel,
        out_shape=jax.ShapeDtypeStruct((mp, c), out_dtype),
        grid=(nt,),
        in_specs=[
            pl.BlockSpec((tm, c), lambda i: (i, 0)),
            pl.BlockSpec((1, c), lambda i: (0, 0)),
            pl.BlockSpec((1, c), lambda i: (0, 0)),
        ],
        out_specs=pl.BlockSpec((tm, c), lambda i: (i, 0)),
        compiler_params=_mosaic_params(),
    )(x_flat, scale, shift)


# ------- Kernel 3: folded-tap conv matmul (bf16 -> f32 acc) + per-tile BN partial stats -------
def _matmul_stats_kernel(taps_ref, w_ref, y_ref, stats_ref):
    y = jnp.dot(taps_ref[...], w_ref[...], preferred_element_type=jnp.float32)
    y_ref[...] = y.astype(y_ref.dtype)                 # bf16 intermediate storage
    s = jnp.sum(y, axis=0, keepdims=True)              # stats from the f32 accumulation
    ss = jnp.sum(y * y, axis=0, keepdims=True)
    stats_ref[...] = jnp.concatenate([s, ss], axis=0)[None]


def matmul_with_stats(taps, w, tm, out_dtype=jnp.bfloat16):
    mp, k = taps.shape
    cout = w.shape[1]
    nt = mp // tm
    return pl.pallas_call(
        _matmul_stats_kernel,
        out_shape=(jax.ShapeDtypeStruct((mp, cout), out_dtype),
                   jax.ShapeDtypeStruct((nt, 2, cout), jnp.float32)),
        grid=(nt,),
        in_specs=[
            pl.BlockSpec((tm, k), lambda i: (i, 0)),
            pl.BlockSpec((k, cout), lambda i: (0, 0)),     # weights resident across tiles
        ],
        out_specs=[
            pl.BlockSpec((tm, cout), lambda i: (i, 0)),
            pl.BlockSpec((1, 2, cout), lambda i: (i, 0, 0)),
        ],
        compiler_params=_mosaic_params(),
    )(taps, w)


# --------- Kernel 4: folded-tap conv matmul + residual (identity or fused 1x1 conv) --------
def _matmul_residual_kernel(*refs, use_shortcut_conv):
    if use_shortcut_conv:
        taps_ref, w_ref, res_ref, wsc_ref, o_ref = refs
        res = jnp.dot(res_ref[...], wsc_ref[...], preferred_element_type=jnp.float32)
    else:
        taps_ref, w_ref, res_ref, o_ref = refs
        res = res_ref[...].astype(jnp.float32)
    y = jnp.dot(taps_ref[...], w_ref[...], preferred_element_type=jnp.float32)
    o_ref[...] = (y + res).astype(o_ref.dtype)


def matmul_add_residual(taps, w, res, wsc=None, *, tm):
    mp, k = taps.shape
    cout = w.shape[1]
    nt = mp // tm
    use_sc = wsc is not None
    in_specs = [
        pl.BlockSpec((tm, k), lambda i: (i, 0)),
        pl.BlockSpec((k, cout), lambda i: (0, 0)),
        pl.BlockSpec((tm, res.shape[1]), lambda i: (i, 0)),
    ]
    args = [taps, w, res]
    if use_sc:
        in_specs.append(pl.BlockSpec(wsc.shape, lambda i: (0, 0)))
        args.append(wsc)
    return pl.pallas_call(
        functools.partial(_matmul_residual_kernel, use_shortcut_conv=use_sc),
        out_shape=jax.ShapeDtypeStruct((mp, cout), jnp.float32),
        grid=(nt,),
        in_specs=in_specs,
        out_specs=pl.BlockSpec((tm, cout), lambda i: (i, 0)),
        compiler_params=_mosaic_params(),
    )(*args)


# ------------------------------ JAX glue (data movement only) ------------------------------
def _im2col_folded(a_nhwc, stride):
    """(N,H,W,C) -> (N*Ho*Wo, 9*C): 3x3 taps (pad=1) folded along the channel axis."""
    N, H, W, C = a_nhwc.shape
    Ho = (H - 1) // stride + 1
    Wo = (W - 1) // stride + 1
    ap = jnp.pad(a_nhwc, ((0, 0), (1, 1), (1, 1), (0, 0)))
    taps = []
    for kh in range(3):
        for kw in range(3):
            win = lax.slice(
                ap, (0, kh, kw, 0),
                (N, kh + stride * (Ho - 1) + 1, kw + stride * (Wo - 1) + 1, C),
                (1, stride, stride, 1))
            taps.append(win.reshape(N * Ho * Wo, C))
    return jnp.concatenate(taps, axis=1), Ho, Wo


def _bn_scale_shift(partial_stats, count, gamma_pad, beta_pad, eps):
    """Finalise training-mode BN from per-tile partial (sum, sumsq). Tiny XLA epilogue."""
    tot = jnp.sum(partial_stats, axis=0)                     # (2, C)
    mean = tot[0] / count
    var = jnp.maximum(tot[1] / count - mean * mean, 0.0)     # biased variance
    scale = gamma_pad * lax.rsqrt(var + eps)
    shift = beta_pad - mean * scale
    return scale.reshape(1, -1).astype(jnp.float32), shift.reshape(1, -1).astype(jnp.float32)


def wrn_basic_block_forward(x_nchw, params, *, stride, eps=1e-3, droprate=0.0, tm_max=TM_MAX):
    """Forward pass of WRNBasicBlock (training-mode BN, dropout p=0)."""
    del droprate  # 0.0 in this configuration (identity)
    N, Cin, H, W = x_nchw.shape
    Cout = params["w1"].shape[0]
    equal_in_out = Cin == Cout          # (equal_in_out with stride != 1 is invalid in the module)

    cin_p = _round_up(Cin, LANE)
    cout_p = _round_up(Cout, LANE)

    # ---- BN1 + ReLU over x :  a = relu1(bn1(x)) ----
    x_nhwc = jnp.transpose(x_nchw, (0, 2, 3, 1)).astype(jnp.float32)
    m1 = N * H * W
    tm1 = _choose_tile_m_elem(m1, cin_p, tm_max)
    m1p = _round_up(m1, tm1)
    x_flat = _pad_axis(_pad_axis(x_nhwc.reshape(m1, Cin), 1, cin_p), 0, m1p)   # (m1p, cin_p) f32

    g1 = _pad_axis(params["g1"].astype(jnp.float32), 0, cin_p)
    b1 = _pad_axis(params["b1"].astype(jnp.float32), 0, cin_p)
    stats1 = channel_partial_stats(x_flat, tm1)
    scale1, shift1 = _bn_scale_shift(stats1, m1, g1, b1, eps)
    a_flat = affine_relu(x_flat, scale1, shift1, tm1, jnp.bfloat16)            # (m1p, cin_p)

    a_nhwc = a_flat[:m1, :Cin].reshape(N, H, W, Cin)                           # compact channels

    # ---- conv1 (3x3, stride) as one folded matmul per tile + BN2 partial stats ----
    taps1, Ho, Wo = _im2col_folded(a_nhwc, stride)                             # (m2, 9*Cin) bf16
    m2 = N * Ho * Wo
    k1p = _round_up(9 * Cin, LANE)
    k2p = _round_up(9 * Cout, LANE)
    tm2 = _choose_tile_m_matmul(m2, max(k1p, k2p), cout_p, tm_max)
    m2p = _round_up(m2, tm2)
    taps1 = _pad_axis(_pad_axis(taps1, 1, k1p), 0, m2p).astype(jnp.bfloat16)

    w1 = jnp.transpose(params["w1"], (2, 3, 1, 0)).reshape(9 * Cin, Cout)      # OIHW -> (9*Cin, Cout)
    w1 = _pad_axis(_pad_axis(w1, 0, k1p), 1, cout_p).astype(jnp.bfloat16)

    pre2, stats2 = matmul_with_stats(taps1, w1, tm2)                           # (m2p, cout_p) bf16

    # ---- BN2 + ReLU :  h = relu2(bn2(conv1(a))) ----
    g2 = _pad_axis(params["g2"].astype(jnp.float32), 0, cout_p)
    b2 = _pad_axis(params["b2"].astype(jnp.float32), 0, cout_p)
    scale2, shift2 = _bn_scale_shift(stats2, m2, g2, b2, eps)
    h_flat = affine_relu(pre2, scale2, shift2, tm2, jnp.bfloat16)              # (m2p, cout_p)
    h_nhwc = h_flat[:m2, :Cout].reshape(N, Ho, Wo, Cout)

    # ---- conv2 (3x3, stride 1) + residual add ----
    taps2, _, _ = _im2col_folded(h_nhwc, 1)                                    # (m2, 9*Cout) bf16
    taps2 = _pad_axis(_pad_axis(taps2, 1, k2p), 0, m2p).astype(jnp.bfloat16)

    w2 = jnp.transpose(params["w2"], (2, 3, 1, 0)).reshape(9 * Cout, Cout)
    w2 = _pad_axis(_pad_axis(w2, 0, k2p), 1, cout_p).astype(jnp.bfloat16)

    if equal_in_out:
        # identity shortcut = original x (stride is 1 here, so m2 == m1); rebuilt against
        # the conv2 row padding so tm1 and tm2 may differ.
        res = _pad_axis(_pad_axis(x_nhwc.reshape(m1, Cin), 1, cin_p), 0, m2p)  # (m2p, cin_p) f32
        out_flat = matmul_add_residual(taps2, w2, res, None, tm=tm2)
    else:
        # shortcut = 1x1 strided conv of a, fused into the same kernel as conv2
        a_nhwc_p = a_flat[:m1].reshape(N, H, W, cin_p)
        a_sub = lax.slice(a_nhwc_p, (0, 0, 0, 0), (N, H, W, cin_p), (1, stride, stride, 1))
        res = _pad_axis(a_sub.reshape(m2, cin_p), 0, m2p)                      # (m2p, cin_p) bf16
        wsc = jnp.transpose(params["wsc"][:, :, 0, 0], (1, 0))                 # (Cin, Cout)
        wsc = _pad_axis(_pad_axis(wsc, 0, cin_p), 1, cout_p).astype(jnp.bfloat16)
        out_flat = matmul_add_residual(taps2, w2, res, wsc, tm=tm2)

    out = out_flat[:m2, :Cout].reshape(N, Ho, Wo, Cout)
    return jnp.transpose(out, (0, 3, 1, 2))                                    # back to NCHW


# ------------------------------ deterministic parameter init ------------------------------
def init_wrn_basic_block_params(key, in_planes, out_planes):
    k1, k2, k3, k4, k5, k6, k7 = jax.random.split(key, 7)
    params = dict(
        w1=0.1 * jax.random.normal(k1, (out_planes, in_planes, 3, 3), jnp.float32),
        w2=0.1 * jax.random.normal(k2, (out_planes, out_planes, 3, 3), jnp.float32),
        g1=1.0 + 0.1 * jax.random.normal(k3, (in_planes,), jnp.float32),
        b1=0.1 * jax.random.normal(k4, (in_planes,), jnp.float32),
        g2=1.0 + 0.1 * jax.random.normal(k5, (out_planes,), jnp.float32),
        b2=0.1 * jax.random.normal(k6, (out_planes,), jnp.float32),
    )
    if in_planes != out_planes:
        params["wsc"] = 0.1 * jax.random.normal(k7, (out_planes, in_planes, 1, 1), jnp.float32)
    return params


# ---------------------- pure-JAX reference (NCHW, mirrors PyTorch, f32) ----------------------
def _bn_train_ref(x, gamma, beta, eps):
    mean = jnp.mean(x, axis=(0, 2, 3), keepdims=True)
    var = jnp.mean((x - mean) ** 2, axis=(0, 2, 3), keepdims=True)
    return (x - mean) / jnp.sqrt(var + eps) * gamma[None, :, None, None] + beta[None, :, None, None]


def _conv_ref(x, w, stride, pad):
    return lax.conv_general_dilated(
        x, w, (stride, stride), [(pad, pad), (pad, pad)],
        dimension_numbers=("NCHW", "OIHW", "NCHW"), precision=REF_PRECISION)


def wrn_basic_block_reference(x, params, *, stride, eps=1e-3):
    Cin, Cout = x.shape[1], params["w1"].shape[0]
    equal = Cin == Cout
    a = jax.nn.relu(_bn_train_ref(x, params["g1"], params["b1"], eps))
    out = _conv_ref(a, params["w1"], stride, 1)
    out = jax.nn.relu(_bn_train_ref(out, params["g2"], params["b2"], eps))
    out = _conv_ref(out, params["w2"], 1, 1)
    res = x if equal else _conv_ref(a, params["wsc"], stride, 0)
    return res + out


if __name__ == "__main__":
    key = jax.random.PRNGKey(0)
    kx, kp1, kp2 = jax.random.split(key, 3)

    # Tolerances are bf16-matmul appropriate: kernels use native bf16 MXU inputs with f32
    # accumulation and a bf16 conv1 intermediate; the reference is f32 / HIGHEST precision.
    ATOL = RTOL = 7e-2

    # Case 1: in_planes != out_planes, stride 2  -> fused 1x1 conv shortcut path.
    x = jax.random.normal(kx, (2, 4, 16, 16), jnp.float32)
    params = init_wrn_basic_block_params(kp1, 4, 8)
    fwd1 = jax.jit(functools.partial(wrn_basic_block_forward, stride=2))
    out = jax.block_until_ready(fwd1(x, params))
    ref = wrn_basic_block_reference(x, params, stride=2)
    assert out.shape == (2, 8, 8, 8), out.shape
    assert jnp.allclose(out, ref, atol=ATOL, rtol=RTOL), float(jnp.max(jnp.abs(out - ref)))

    # Case 2: in_planes == out_planes, stride 1 -> identity shortcut path.
    x2 = jax.random.normal(kx, (2, 8, 16, 16), jnp.float32)
    params2 = init_wrn_basic_block_params(kp2, 8, 8)
    fwd2 = jax.jit(functools.partial(wrn_basic_block_forward, stride=1))
    out2 = jax.block_until_ready(fwd2(x2, params2))
    ref2 = wrn_basic_block_reference(x2, params2, stride=1)
    assert out2.shape == (2, 8, 16, 16), out2.shape
    assert jnp.allclose(out2, ref2, atol=ATOL, rtol=RTOL), float(jnp.max(jnp.abs(out2 - ref2)))

    print("KERNEL_OK")
</pallas_src>

<mosaic_0001>
module attributes {stable_mosaic.version = 11 : i64} {
  func.func @_stats_kernel(%arg0: i32, %arg1: memref<512x128xf32, #tpu.memory_space<vmem>>, %arg2: memref<1x2x128xf32, #tpu.memory_space<vmem>>) attributes {dimension_semantics = [#tpu.dimension_semantics<parallel>], iteration_bounds = array<i64: 1>, scalar_prefetch = 0 : i64, scratch_operands = 0 : i64, tpu.core_type = #tpu.core_type<tc>, window_params = [{transform_indices = @transform_0, window_bounds = array<i64: 512, 128>}, {transform_indices = @transform_1, window_bounds = array<i64: 1, 2, 128>}]} {
    %c0 = arith.constant 0 : index
    %c0_0 = arith.constant 0 : index
    %0 = vector.load %arg1[%c0, %c0_0] : memref<512x128xf32, #tpu.memory_space<vmem>>, vector<512x128xf32>
    %cst = arith.constant dense<0.000000e+00> : vector<128xf32>
    %1 = vector.multi_reduction <add>, %0, %cst [0] : vector<512x128xf32> to vector<128xf32>
    %2 = vector.shape_cast %1 : vector<128xf32> to vector<1x128xf32>
    %3 = arith.mulf %0, %0 : vector<512x128xf32>
    %cst_1 = arith.constant dense<0.000000e+00> : vector<128xf32>
    %4 = vector.multi_reduction <add>, %3, %cst_1 [0] : vector<512x128xf32> to vector<128xf32>
    %5 = vector.shape_cast %4 : vector<128xf32> to vector<1x128xf32>
    %6 = tpu.concatenate %2, %5 in 0 : vector<1x128xf32>, vector<1x128xf32> -> vector<2x128xf32>
    %7 = vector.shape_cast %6 : vector<2x128xf32> to vector<1x2x128xf32>
    %c0_2 = arith.constant 0 : index
    %c0_3 = arith.constant 0 : index
    %c0_4 = arith.constant 0 : index
    %8 = vector.load %arg2[%c0_2, %c0_3, %c0_4] : memref<1x2x128xf32, #tpu.memory_space<vmem>>, vector<1x2x128xf32>
    tpu.vector_store %arg2[%c0_2, %c0_3, %c0_4], %7 {strides = array<i32>} : memref<1x2x128xf32, #tpu.memory_space<vmem>>, vector<1x2x128xf32>,
    return
  }
  func.func @transform_0(%arg0: i32) -> (i32, i32) {
    %c0_i32 = arith.constant 0 : i32
    %c0_i32_0 = arith.constant 0 : i32
    return %arg0, %c0_i32 : i32, i32
  }
  func.func @transform_1(%arg0: i32) -> (i32, i32, i32) {
    %c0_i32 = arith.constant 0 : i32
    %c0_i32_0 = arith.constant 0 : i32
    %c0_i32_1 = arith.constant 0 : i32
    return %arg0, %c0_i32, %c0_i32_0 : i32, i32, i32
  }
}

module attributes {stable_mosaic.version = 11 : i64} {
  func.func @_affine_relu_kernel(%arg0: i32, %arg1: memref<512x128xf32, #tpu.memory_space<vmem>>, %arg2: memref<1x128xf32, #tpu.memory_space<vmem>>, %arg3: memref<1x128xf32, #tpu.memory_space<vmem>>, %arg4: memref<512x128xbf16, #tpu.memory_space<vmem>>) attributes {dimension_semantics = [#tpu.dimension_semantics<parallel>], iteration_bounds = array<i64: 1>, scalar_prefetch = 0 : i64, scratch_operands = 0 : i64, tpu.core_type = #tpu.core_type<tc>, window_params = [{transform_indices = @transform_0, window_bounds = array<i64: 512, 128>}, {pipeline_mode = #tpu.pipeline_mode<synchronous>, transform_indices = @transform_1, window_bounds = array<i64: 1, 128>}, {pipeline_mode = #tpu.pipeline_mode<synchronous>, transform_indices = @transform_2, window_bounds = array<i64: 1, 128>}, {transform_indices = @transform_3, window_bounds = array<i64: 512, 128>}]} {
    %c0 = arith.constant 0 : index
    %c0_0 = arith.constant 0 : index
    %0 = vector.load %arg1[%c0, %c0_0] : memref<512x128xf32, #tpu.memory_space<vmem>>, vector<512x128xf32>
    %c0_1 = arith.constant 0 : index
    %c0_2 = arith.constant 0 : index
    %1 = vector.load %arg2[%c0_1, %c0_2] : memref<1x128xf32, #tpu.memory_space<vmem>>, vector<1x128xf32>
    %2 = vector.broadcast %1 : vector<1x128xf32> to vector<512x128xf32>
    %3 = arith.mulf %0, %2 : vector<512x128xf32>
    %c0_3 = arith.constant 0 : index
    %c0_4 = arith.constant 0 : index
    %4 = vector.load %arg3[%c0_3, %c0_4] : memref<1x128xf32, #tpu.memory_space<vmem>>, vector<1x128xf32>
    %5 = vector.broadcast %4 : vector<1x128xf32> to vector<512x128xf32>
    %6 = arith.addf %3, %5 : vector<512x128xf32>
    %cst = arith.constant 0.000000e+00 : f32
    %7 = vector.broadcast %cst : f32 to vector<512x128xf32>
    %8 = arith.maximumf %6, %7 : vector<512x128xf32>
    %9 = arith.truncf %8 : vector<512x128xf32> to vector<512x128xbf16>
    %c0_5 = arith.constant 0 : index
    %c0_6 = arith.constant 0 : index
    %10 = vector.load %arg4[%c0_5, %c0_6] : memref<512x128xbf16, #tpu.memory_space<vmem>>, vector<512x128xbf16>
    tpu.vector_store %arg4[%c0_5, %c0_6], %9 {strides = array<i32>} : memref<512x128xbf16, #tpu.memory_space<vmem>>, vector<512x128xbf16>,
    return
  }
  func.func @transform_0(%arg0: i32) -> (i32, i32) {
    %c0_i32 = arith.constant 0 : i32
    %c0_i32_0 = arith.constant 0 : i32
    return %arg0, %c0_i32 : i32, i32
  }
  func.func @transform_1(%arg0: i32) -> (i32, i32) {
    %c0_i32 = arith.constant 0 : i32
    %c0_i32_0 = arith.constant 0 : i32
    %c0_i32_1 = arith.constant 0 : i32
    return %c0_i32, %c0_i32_0 : i32, i32
  }
  func.func @transform_2(%arg0: i32) -> (i32, i32) {
    %c0_i32 = arith.constant 0 : i32
    %c0_i32_0 = arith.constant 0 : i32
    %c0_i32_1 = arith.constant 0 : i32
    return %c0_i32, %c0_i32_0 : i32, i32
  }
  func.func @transform_3(%arg0: i32) -> (i32, i32) {
    %c0_i32 = arith.constant 0 : i32
    %c0_i32_0 = arith.constant 0 : i32
    return %arg0, %c0_i32 : i32, i32
  }
}

module attributes {stable_mosaic.version = 11 : i64} {
  func.func @_affine_relu_kernel(%arg0: i32, %arg1: memref<128x128xbf16, #tpu.memory_space<vmem>>, %arg2: memref<1x128xf32, #tpu.memory_space<vmem>>, %arg3: memref<1x128xf32, #tpu.memory_space<vmem>>, %arg4: memref<128x128xbf16, #tpu.memory_space<vmem>>) attributes {dimension_semantics = [#tpu.dimension_semantics<parallel>], iteration_bounds = array<i64: 1>, scalar_prefetch = 0 : i64, scratch_operands = 0 : i64, tpu.core_type = #tpu.core_type<tc>, window_params = [{transform_indices = @transform_0, window_bounds = array<i64: 128, 128>}, {pipeline_mode = #tpu.pipeline_mode<synchronous>, transform_indices = @transform_1, window_bounds = array<i64: 1, 128>}, {pipeline_mode = #tpu.pipeline_mode<synchronous>, transform_indices = @transform_2, window_bounds = array<i64: 1, 128>}, {transform_indices = @transform_3, window_bounds = array<i64: 128, 128>}]} {
    %c0 = arith.constant 0 : index
    %c0_0 = arith.constant 0 : index
    %0 = vector.load %arg1[%c0, %c0_0] : memref<128x128xbf16, #tpu.memory_space<vmem>>, vector<128x128xbf16>
    %1 = arith.extf %0 : vector<128x128xbf16> to vector<128x128xf32>
    %c0_1 = arith.constant 0 : index
    %c0_2 = arith.constant 0 : index
    %2 = vector.load %arg2[%c0_1, %c0_2] : memref<1x128xf32, #tpu.memory_space<vmem>>, vector<1x128xf32>
    %3 = vector.broadcast %2 : vector<1x128xf32> to vector<128x128xf32>
    %4 = arith.mulf %1, %3 : vector<128x128xf32>
    %c0_3 = arith.constant 0 : index
    %c0_4 = arith.constant 0 : index
    %5 = vector.load %arg3[%c0_3, %c0_4] : memref<1x128xf32, #tpu.memory_space<vmem>>, vector<1x128xf32>
    %6 = vector.broadcast %5 : vector<1x128xf32> to vector<128x128xf32>
    %7 = arith.addf %4, %6 : vector<128x128xf32>
    %cst = arith.constant 0.000000e+00 : f32
    %8 = vector.broadcast %cst : f32 to vector<128x128xf32>
    %9 = arith.maximumf %7, %8 : vector<128x128xf32>
    %10 = arith.truncf %9 : vector<128x128xf32> to vector<128x128xbf16>
    %c0_5 = arith.constant 0 : index
    %c0_6 = arith.constant 0 : index
    %11 = vector.load %arg4[%c0_5, %c0_6] : memref<128x128xbf16, #tpu.memory_space<vmem>>, vector<128x128xbf16>
    tpu.vector_store %arg4[%c0_5, %c0_6], %10 {strides = array<i32>} : memref<128x128xbf16, #tpu.memory_space<vmem>>, vector<128x128xbf16>,
    return
  }
  func.func @transform_0(%arg0: i32) -> (i32, i32) {
    %c0_i32 = arith.constant 0 : i32
    %c0_i32_0 = arith.constant 0 : i32
    return %arg0, %c0_i32 : i32, i32
  }
  func.func @transform_1(%arg0: i32) -> (i32, i32) {
    %c0_i32 = arith.constant 0 : i32
    %c0_i32_0 = arith.constant 0 : i32
    %c0_i32_1 = arith.constant 0 : i32
    return %c0_i32, %c0_i32_0 : i32, i32
  }
  func.func @transform_2(%arg0: i32) -> (i32, i32) {
    %c0_i32 = arith.constant 0 : i32
    %c0_i32_0 = arith.constant 0 : i32
    %c0_i32_1 = arith.constant 0 : i32
    return %c0_i32, %c0_i32_0 : i32, i32
  }
  func.func @transform_3(%arg0: i32) -> (i32, i32) {
    %c0_i32 = arith.constant 0 : i32
    %c0_i32_0 = arith.constant 0 : i32
    return %arg0, %c0_i32 : i32, i32
  }
}

module attributes {stable_mosaic.version = 11 : i64} {
  func.func @_matmul_stats_kernel(%arg0: i32, %arg1: memref<128x128xbf16, #tpu.memory_space<vmem>>, %arg2: memref<128x128xbf16, #tpu.memory_space<vmem>>, %arg3: memref<128x128xbf16, #tpu.memory_space<vmem>>, %arg4: memref<1x2x128xf32, #tpu.memory_space<vmem>>) attributes {dimension_semantics = [#tpu.dimension_semantics<parallel>], iteration_bounds = array<i64: 1>, scalar_prefetch = 0 : i64, scratch_operands = 0 : i64, tpu.core_type = #tpu.core_type<tc>, window_params = [{transform_indices = @transform_0, window_bounds = array<i64: 128, 128>}, {pipeline_mode = #tpu.pipeline_mode<synchronous>, transform_indices = @transform_1, window_bounds = array<i64: 128, 128>}, {transform_indices = @transform_2, window_bounds = array<i64: 128, 128>}, {transform_indices = @transform_3, window_bounds = array<i64: 1, 2, 128>}]} {
    %c0 = arith.constant 0 : index
    %c0_0 = arith.constant 0 : index
    %0 = vector.load %arg1[%c0, %c0_0] : memref<128x128xbf16, #tpu.memory_space<vmem>>, vector<128x128xbf16>
    %c0_1 = arith.constant 0 : index
    %c0_2 = arith.constant 0 : index
    %1 = vector.load %arg2[%c0_1, %c0_2] : memref<128x128xbf16, #tpu.memory_space<vmem>>, vector<128x128xbf16>
    %cst = arith.constant dense<0.000000e+00> : vector<128x128xf32>
    %2 = tpu.matmul %0, %1, %cst {dimension_numbers = #tpu.dot_dimension_numbers<[1], [0], [0], [1], [0, 0, 1, 1], [], []>} : vector<128x128xbf16>, vector<128x128xbf16>, vector<128x128xf32> -> vector<128x128xf32>
    %3 = arith.truncf %2 : vector<128x128xf32> to vector<128x128xbf16>
    %c0_3 = arith.constant 0 : index
    %c0_4 = arith.constant 0 : index
    %4 = vector.load %arg3[%c0_3, %c0_4] : memref<128x128xbf16, #tpu.memory_space<vmem>>, vector<128x128xbf16>
    tpu.vector_store %arg3[%c0_3, %c0_4], %3 {strides = array<i32>} : memref<128x128xbf16, #tpu.memory_space<vmem>>, vector<128x128xbf16>,
    %cst_5 = arith.constant dense<0.000000e+00> : vector<128xf32>
    %5 = vector.multi_reduction <add>, %2, %cst_5 [0] : vector<128x128xf32> to vector<128xf32>
    %6 = vector.shape_cast %5 : vector<128xf32> to vector<1x128xf32>
    %7 = arith.mulf %2, %2 : vector<128x128xf32>
    %cst_6 = arith.constant dense<0.000000e+00> : vector<128xf32>
    %8 = vector.multi_reduction <add>, %7, %cst_6 [0] : vector<128x128xf32> to vector<128xf32>
    %9 = vector.shape_cast %8 : vector<128xf32> to vector<1x128xf32>
    %10 = tpu.concatenate %6, %9 in 0 : vector<1x128xf32>, vector<1x128xf32> -> vector<2x128xf32>
    %11 = vector.shape_cast %10 : vector<2x128xf32> to vector<1x2x128xf32>
    %c0_7 = arith.constant 0 : index
    %c0_8 = arith.constant 0 : index
    %c0_9 = arith.constant 0 : index
    %12 = vector.load %arg4[%c0_7, %c0_8, %c0_9] : memref<1x2x128xf32, #tpu.memory_space<vmem>>, vector<1x2x128xf32>
    tpu.vector_store %arg4[%c0_7, %c0_8, %c0_9], %11 {strides = array<i32>} : memref<1x2x128xf32, #tpu.memory_space<vmem>>, vector<1x2x128xf32>,
    return
  }
  func.func @transform_0(%arg0: i32) -> (i32, i32) {
    %c0_i32 = arith.constant 0 : i32
    %c0_i32_0 = arith.constant 0 : i32
    return %arg0, %c0_i32 : i32, i32
  }
  func.func @transform_1(%arg0: i32) -> (i32, i32) {
    %c0_i32 = arith.constant 0 : i32
    %c0_i32_0 = arith.constant 0 : i32
    %c0_i32_1 = arith.constant 0 : i32
    return %c0_i32, %c0_i32_0 : i32, i32
  }
  func.func @transform_2(%arg0: i32) -> (i32, i32) {
    %c0_i32 = arith.constant 0 : i32
    %c0_i32_0 = arith.constant 0 : i32
    return %arg0, %c0_i32 : i32, i32
  }
  func.func @transform_3(%arg0: i32) -> (i32, i32, i32) {
    %c0_i32 = arith.constant 0 : i32
    %c0_i32_0 = arith.constant 0 : i32
    %c0_i32_1 = arith.constant 0 : i32
    return %arg0, %c0_i32, %c0_i32_0 : i32, i32, i32
  }
}

module attributes {stable_mosaic.version = 11 : i64} {
  func.func @_matmul_residual_kernel(%arg0: i32, %arg1: memref<128x128xbf16, #tpu.memory_space<vmem>>, %arg2: memref<128x128xbf16, #tpu.memory_space<vmem>>, %arg3: memref<128x128xbf16, #tpu.memory_space<vmem>>, %arg4: memref<128x128xbf16, #tpu.memory_space<vmem>>, %arg5: memref<128x128xf32, #tpu.memory_space<vmem>>) attributes {dimension_semantics = [#tpu.dimension_semantics<parallel>], iteration_bounds = array<i64: 1>, scalar_prefetch = 0 : i64, scratch_operands = 0 : i64, tpu.core_type = #tpu.core_type<tc>, window_params = [{transform_indices = @transform_0, window_bounds = array<i64: 128, 128>}, {pipeline_mode = #tpu.pipeline_mode<synchronous>, transform_indices = @transform_1, window_bounds = array<i64: 128, 128>}, {transform_indices = @transform_2, window_bounds = array<i64: 128, 128>}, {pipeline_mode = #tpu.pipeline_mode<synchronous>, transform_indices = @transform_3, window_bounds = array<i64: 128, 128>}, {transform_indices = @transform_4, window_bounds = array<i64: 128, 128>}]} {
    %c0 = arith.constant 0 : index
    %c0_0 = arith.constant 0 : index
    %0 = vector.load %arg3[%c0, %c0_0] : memref<128x128xbf16, #tpu.memory_space<vmem>>, vector<128x128xbf16>
    %c0_1 = arith.constant 0 : index
    %c0_2 = arith.constant 0 : index
    %1 = vector.load %arg4[%c0_1, %c0_2] : memref<128x128xbf16, #tpu.memory_space<vmem>>, vector<128x128xbf16>
    %cst = arith.constant dense<0.000000e+00> : vector<128x128xf32>
    %2 = tpu.matmul %0, %1, %cst {dimension_numbers = #tpu.dot_dimension_numbers<[1], [0], [0], [1], [0, 0, 1, 1], [], []>} : vector<128x128xbf16>, vector<128x128xbf16>, vector<128x128xf32> -> vector<128x128xf32>
    %c0_3 = arith.constant 0 : index
    %c0_4 = arith.constant 0 : index
    %3 = vector.load %arg1[%c0_3, %c0_4] : memref<128x128xbf16, #tpu.memory_space<vmem>>, vector<128x128xbf16>
    %c0_5 = arith.constant 0 : index
    %c0_6 = arith.constant 0 : index
    %4 = vector.load %arg2[%c0_5, %c0_6] : memref<128x128xbf16, #tpu.memory_space<vmem>>, vector<128x128xbf16>
    %cst_7 = arith.constant dense<0.000000e+00> : vector<128x128xf32>
    %5 = tpu.matmul %3, %4, %cst_7 {dimension_numbers = #tpu.dot_dimension_numbers<[1], [0], [0], [1], [0, 0, 1, 1], [], []>} : vector<128x128xbf16>, vector<128x128xbf16>, vector<128x128xf32> -> vector<128x128xf32>
    %6 = arith.addf %5, %2 : vector<128x128xf32>
    %c0_8 = arith.constant 0 : index
    %c0_9 = arith.constant 0 : index
    %7 = vector.load %arg5[%c0_8, %c0_9] : memref<128x128xf32, #tpu.memory_space<vmem>>, vector<128x128xf32>
    tpu.vector_store %arg5[%c0_8, %c0_9], %6 {strides = array<i32>} : memref<128x128xf32, #tpu.memory_space<vmem>>, vector<128x128xf32>,
    return
  }
  func.func @transform_0(%arg0: i32) -> (i32, i32) {
    %c0_i32 = arith.constant 0 : i32
    %c0_i32_0 = arith.constant 0 : i32
    return %arg0, %c0_i32 : i32, i32
  }
  func.func @transform_1(%arg0: i32) -> (i32, i32) {
    %c0_i32 = arith.constant 0 : i32
    %c0_i32_0 = arith.constant 0 : i32
    %c0_i32_1 = arith.constant 0 : i32
    return %c0_i32, %c0_i32_0 : i32, i32
  }
  func.func @transform_2(%arg0: i32) -> (i32, i32) {
    %c0_i32 = arith.constant 0 : i32
    %c0_i32_0 = arith.constant 0 : i32
    return %arg0, %c0_i32 : i32, i32
  }
  func.func @transform_3(%arg0: i32) -> (i32, i32) {
    %c0_i32 = arith.constant 0 : i32
    %c0_i32_0 = arith.constant 0 : i32
    %c0_i32_1 = arith.constant 0 : i32
    return %c0_i32, %c0_i32_0 : i32, i32
  }
  func.func @transform_4(%arg0: i32) -> (i32, i32) {
    %c0_i32 = arith.constant 0 : i32
    %c0_i32_0 = arith.constant 0 : i32
    return %arg0, %c0_i32 : i32, i32
  }
}

</mosaic_0001>

<bundles_post_ra>
// kernel: wrn_basic_block_forward.5
= control target key start
LH: loop header
LB: loop body
LE: loop exit
PB: predicated region body
PF: predicated region fallthrough
CT: control target
= control target key end

     0   :  { %vm274_vm0 = vcmask 1040384   ;;  %s486_s0 = inlined_call_operand.vmem [shape: f32[512,128], index: 0, kind: input, shape index: {}]   ;;  %s487_s1 = inlined_call_operand.vmem [shape: f32[1,2,128], index: 1, kind: output, shape index: {}]  }
   0x1   :  { %v8_v0 = vld [vmem:[%s486_s0] sm:$0xff]  ;;  %v9_v1 = vld [vmem:[%s486_s0 + $0x8] sm:$0xff]  ;;  %v10_v2 = vld [vmem:[%s486_s0 + $0x10] sm:$0xff] }
   0x2   :  { %v11_v3 = vld [vmem:[%s486_s0 + $0x18] sm:$0xff]  ;;  %v72_v4 = vadd.f32 %v9_v1, %v8_v0  ;;  %v141_v5 = vmul.f32 %v8_v0, %v8_v0  ;;  %v142_v6 = vmul.f32 %v9_v1, %v9_v1  ;;  %v143_v7 = vmul.f32 %v10_v2, %v10_v2  ;;  %v12_v8 = vld [vmem:[%s486_s0 + $0x20] sm:$0xff]  ;;  %v13_v12 = vld [vmem:[%s486_s0 + $0x28] sm:$0xff] }
   0x3   :  { %v144_v10 = vmul.f32 %v11_v3, %v11_v3  ;;  %v145_v14 = vmul.f32 %v12_v8, %v12_v8  ;;  %v14_v16 = vld [vmem:[%s486_s0 + $0x30] sm:$0xff]  ;;  %v146_v18 = vmul.f32 %v13_v12, %v13_v12  ;;  %v15_v20 = vld [vmem:[%s486_s0 + $0x38] sm:$0xff]  ;;  %v16_v24 = vld [vmem:[%s486_s0 + $0x40] sm:$0xff] }
   0x4   :  { %v73_v9 = vadd.f32 %v72_v4, %v10_v2  ;;  %v205_v11 = vadd.f32 %v142_v6, %v141_v5  ;;  %v147_v22 = vmul.f32 %v14_v16, %v14_v16  ;;  %v148_v26 = vmul.f32 %v15_v20, %v15_v20  ;;  %v17_v28 = vld [vmem:[%s486_s0 + $0x48] sm:$0xff]  ;;  %v18_v32 = vld [vmem:[%s486_s0 + $0x50] sm:$0xff]  ;;  %v19_v36 = vld [vmem:[%s486_s0 + $0x58] sm:$0xff] }
   0x5   :  { %v149_v30 = vmul.f32 %v16_v24, %v16_v24  ;;  %v150_v34 = vmul.f32 %v17_v28, %v17_v28  ;;  %v151_v38 = vmul.f32 %v18_v32, %v18_v32  ;;  %v20_v40 = vld [vmem:[%s486_s0 + $0x60] sm:$0xff]  ;;  %v152_v42 = vmul.f32 %v19_v36, %v19_v36  ;;  %v21_v44 = vld [vmem:[%s486_s0 + $0x68] sm:$0xff]  ;;  %v22_v48 = vld [vmem:[%s486_s0 + $0x70] sm:$0xff] }
   0x6   :  { %v74_v13 = vadd.f32 %v73_v9, %v11_v3  ;;  %v206_v15 = vadd.f32 %v205_v11, %v143_v7  ;;  %v153_v46 = vmul.f32 %v20_v40, %v20_v40  ;;  %v154_v50 = vmul.f32 %v21_v44, %v21_v44  ;;  %v23_v52 = vld [vmem:[%s486_s0 + $0x78] sm:$0xff]  ;;  %v24_v56 = vld [vmem:[%s486_s0 + $0x80] sm:$0xff]  ;;  %v25_v60 = vld [vmem:[%s486_s0 + $0x88] sm:$0xff] }
   0x7   :  { %v155_v54 = vmul.f32 %v22_v48, %v22_v48  ;;  %v156_v58 = vmul.f32 %v23_v52, %v23_v52  ;;  %v157_v62 = vmul.f32 %v24_v56, %v24_v56  ;;  %v26_v0 = vld [vmem:[%s486_s0 + $0x90] sm:$0xff]  ;;  %v158_v2 = vmul.f32 %v25_v60, %v25_v60  ;;  %v27_v4 = vld [vmem:[%s486_s0 + $0x98] sm:$0xff] }
   0x8   :  { %v75_v17 = vadd.f32 %v74_v13, %v12_v8  ;;  %v207_v19 = vadd.f32 %v206_v15, %v144_v10  ;;  %v159_v6 = vmul.f32 %v26_v0, %v26_v0  ;;  %v28_v8 = vld [vmem:[%s486_s0 + $0xa0] sm:$0xff]  ;;  %v160_v10 = vmul.f32 %v27_v4, %v27_v4 }
   0xa   :  { %v76_v21 = vadd.f32 %v75_v17, %v13_v12  ;;  %v208_v23 = vadd.f32 %v207_v19, %v145_v14  ;;  %v29_v12 = vld [vmem:[%s486_s0 + $0xa8] sm:$0xff]  ;;  %v161_v14 = vmul.f32 %v28_v8, %v28_v8 }
   0xc   :  { %v77_v25 = vadd.f32 %v76_v21, %v14_v16  ;;  %v209_v27 = vadd.f32 %v208_v23, %v146_v18  ;;  %v30_v16 = vld [vmem:[%s486_s0 + $0xb0] sm:$0xff]  ;;  %v162_v18 = vmul.f32 %v29_v12, %v29_v12 }
   0xe   :  { %v78_v29 = vadd.f32 %v77_v25, %v15_v20  ;;  %v210_v31 = vadd.f32 %v209_v27, %v147_v22  ;;  %v31_v20 = vld [vmem:[%s486_s0 + $0xb8] sm:$0xff]  ;;  %v163_v22 = vmul.f32 %v30_v16, %v30_v16 }
  0x10   :  { %v79_v33 = vadd.f32 %v78_v29, %v16_v24  ;;  %v211_v35 = vadd.f32 %v210_v31, %v148_v26  ;;  %v32_v24 = vld [vmem:[%s486_s0 + $0xc0] sm:$0xff]  ;;  %v164_v26 = vmul.f32 %v31_v20, %v31_v20 }
  0x12   :  { %v80_v37 = vadd.f32 %v79_v33, %v17_v28  ;;  %v212_v39 = vadd.f32 %v211_v35, %v149_v30  ;;  %v33_v28 = vld [vmem:[%s486_s0 + $0xc8] sm:$0xff]  ;;  %v165_v30 = vmul.f32 %v32_v24, %v32_v24 }
  0x14   :  { %v81_v41 = vadd.f32 %v80_v37, %v18_v32  ;;  %v213_v43 = vadd.f32 %v212_v39, %v150_v34  ;;  %v34_v32 = vld [vmem:[%s486_s0 + $0xd0] sm:$0xff]  ;;  %v166_v34 = vmul.f32 %v33_v28, %v33_v28 }
  0x16   :  { %v82_v45 = vadd.f32 %v81_v41, %v19_v36  ;;  %v214_v47 = vadd.f32 %v213_v43, %v151_v38  ;;  %v35_v36 = vld [vmem:[%s486_s0 + $0xd8] sm:$0xff]  ;;  %v167_v38 = vmul.f32 %v34_v32, %v34_v32 }
  0x18   :  { %v83_v49 = vadd.f32 %v82_v45, %v20_v40  ;;  %v215_v51 = vadd.f32 %v214_v47, %v152_v42  ;;  %v36_v40 = vld [vmem:[%s486_s0 + $0xe0] sm:$0xff]  ;;  %v168_v42 = vmul.f32 %v35_v36, %v35_v36 }
  0x1a   :  { %v84_v53 = vadd.f32 %v83_v49, %v21_v44  ;;  %v216_v55 = vadd.f32 %v215_v51, %v153_v46  ;;  %v37_v44 = vld [vmem:[%s486_s0 + $0xe8] sm:$0xff]  ;;  %v169_v46 = vmul.f32 %v36_v40, %v36_v40 }
  0x1c   :  { %v85_v57 = vadd.f32 %v84_v53, %v22_v48  ;;  %v217_v59 = vadd.f32 %v216_v55, %v154_v50  ;;  %v38_v48 = vld [vmem:[%s486_s0 + $0xf0] sm:$0xff]  ;;  %v170_v50 = vmul.f32 %v37_v44, %v37_v44 }
  0x1e   :  { %v86_v61 = vadd.f32 %v85_v57, %v23_v52  ;;  %v218_v63 = vadd.f32 %v217_v59, %v155_v54  ;;  %v39_v52 = vld [vmem:[%s486_s0 + $0xf8] sm:$0xff]  ;;  %v171_v54 = vmul.f32 %v38_v48, %v38_v48 }
  0x20   :  { %v87_v1 = vadd.f32 %v86_v61, %v24_v56  ;;  %v219_v3 = vadd.f32 %v218_v63, %v156_v58  ;;  %v40_v56 = vld [vmem:[%s486_s0 + $0x100] sm:$0xff]  ;;  %v172_v58 = vmul.f32 %v39_v52, %v39_v52 }
  0x22   :  { %v88_v5 = vadd.f32 %v87_v1, %v25_v60  ;;  %v220_v7 = vadd.f32 %v219_v3, %v157_v62  ;;  %v41_v60 = vld [vmem:[%s486_s0 + $0x108] sm:$0xff]  ;;  %v173_v62 = vmul.f32 %v40_v56, %v40_v56 }
  0x24   :  { %v89_v9 = vadd.f32 %v88_v5, %v26_v0  ;;  %v221_v11 = vadd.f32 %v220_v7, %v158_v2  ;;  %v42_v0 = vld [vmem:[%s486_s0 + $0x110] sm:$0xff]  ;;  %v174_v2 = vmul.f32 %v41_v60, %v41_v60 }
  0x26   :  { %v90_v13 = vadd.f32 %v89_v9, %v27_v4  ;;  %v222_v15 = vadd.f32 %v221_v11, %v159_v6  ;;  %v43_v4 = vld [vmem:[%s486_s0 + $0x118] sm:$0xff]  ;;  %v175_v6 = vmul.f32 %v42_v0, %v42_v0 }
  0x28   :  { %v91_v17 = vadd.f32 %v90_v13, %v28_v8  ;;  %v223_v19 = vadd.f32 %v222_v15, %v160_v10  ;;  %v44_v8 = vld [vmem:[%s486_s0 + $0x120] sm:$0xff]  ;;  %v176_v10 = vmul.f32 %v43_v4, %v43_v4 }
  0x2a   :  { %v92_v21 = vadd.f32 %v91_v17, %v29_v12  ;;  %v224_v23 = vadd.f32 %v223_v19, %v161_v14  ;;  %v45_v12 = vld [vmem:[%s486_s0 + $0x128] sm:$0xff]  ;;  %v177_v14 = vmul.f32 %v44_v8, %v44_v8 }
  0x2c   :  { %v93_v25 = vadd.f32 %v92_v21, %v30_v16  ;;  %v225_v27 = vadd.f32 %v224_v23, %v162_v18  ;;  %v46_v16 = vld [vmem:[%s486_s0 + $0x130] sm:$0xff]  ;;  %v178_v18 = vmul.f32 %v45_v12, %v45_v12 }
  0x2e   :  { %v94_v29 = vadd.f32 %v93_v25, %v31_v20  ;;  %v226_v31 = vadd.f32 %v225_v27, %v163_v22  ;;  %v47_v20 = vld [vmem:[%s486_s0 + $0x138] sm:$0xff]  ;;  %v179_v22 = vmul.f32 %v46_v16, %v46_v16 }
  0x30   :  { %v95_v33 = vadd.f32 %v94_v29, %v32_v24  ;;  %v227_v35 = vadd.f32 %v226_v31, %v164_v26  ;;  %v48_v24 = vld [vmem:[%s486_s0 + $0x140] sm:$0xff]  ;;  %v180_v26 = vmul.f32 %v47_v20, %v47_v20 }
  0x32   :  { %v96_v37 = vadd.f32 %v95_v33, %v33_v28  ;;  %v228_v39 = vadd.f32 %v227_v35, %v165_v30  ;;  %v49_v28 = vld [vmem:[%s486_s0 + $0x148] sm:$0xff]  ;;  %v181_v30 = vmul.f32 %v48_v24, %v48_v24 }
  0x34   :  { %v97_v41 = vadd.f32 %v96_v37, %v34_v32  ;;  %v229_v43 = vadd.f32 %v228_v39, %v166_v34  ;;  %v50_v32 = vld [vmem:[%s486_s0 + $0x150] sm:$0xff]  ;;  %v182_v34 = vmul.f32 %v49_v28, %v49_v28 }
  0x36   :  { %v98_v45 = vadd.f32 %v97_v41, %v35_v36  ;;  %v230_v47 = vadd.f32 %v229_v43, %v167_v38  ;;  %v51_v36 = vld [vmem:[%s486_s0 + $0x158] sm:$0xff]  ;;  %v183_v38 = vmul.f32 %v50_v32, %v50_v32 }
  0x38   :  { %v99_v49 = vadd.f32 %v98_v45, %v36_v40  ;;  %v231_v51 = vadd.f32 %v230_v47, %v168_v42  ;;  %v52_v40 = vld [vmem:[%s486_s0 + $0x160] sm:$0xff]  ;;  %v184_v42 = vmul.f32 %v51_v36, %v51_v36 }
  0x3a   :  { %v100_v53 = vadd.f32 %v99_v49, %v37_v44  ;;  %v232_v55 = vadd.f32 %v231_v51, %v169_v46  ;;  %v53_v44 = vld [vmem:[%s486_s0 + $0x168] sm:$0xff]  ;;  %v185_v46 = vmul.f32 %v52_v40, %v52_v40 }
  0x3c   :  { %v101_v57 = vadd.f32 %v100_v53, %v38_v48  ;;  %v233_v59 = vadd.f32 %v232_v55, %v170_v50  ;;  %v54_v48 = vld [vmem:[%s486_s0 + $0x170] sm:$0xff]  ;;  %v186_v50 = vmul.f32 %v53_v44, %v53_v44 }
  0x3e   :  { %v102_v61 = vadd.f32 %v101_v57, %v39_v52  ;;  %v234_v63 = vadd.f32 %v233_v59, %v171_v54  ;;  %v55_v52 = vld [vmem:[%s486_s0 + $0x178] sm:$0xff]  ;;  %v187_v54 = vmul.f32 %v54_v48, %v54_v48 }
  0x40   :  { %v103_v1 = vadd.f32 %v102_v61, %v40_v56  ;;  %v235_v3 = vadd.f32 %v234_v63, %v172_v58  ;;  %v56_v56 = vld [vmem:[%s486_s0 + $0x180] sm:$0xff]  ;;  %v188_v58 = vmul.f32 %v55_v52, %v55_v52 }
  0x42   :  { %v104_v5 = vadd.f32 %v103_v1, %v41_v60  ;;  %v236_v7 = vadd.f32 %v235_v3, %v173_v62  ;;  %v57_v60 = vld [vmem:[%s486_s0 + $0x188] sm:$0xff]  ;;  %v189_v62 = vmul.f32 %v56_v56, %v56_v56 }
  0x44   :  { %v105_v9 = vadd.f32 %v104_v5, %v42_v0  ;;  %v237_v11 = vadd.f32 %v236_v7, %v174_v2  ;;  %v58_v0 = vld [vmem:[%s486_s0 + $0x190] sm:$0xff]  ;;  %v190_v2 = vmul.f32 %v57_v60, %v57_v60 }
  0x46   :  { %v106_v13 = vadd.f32 %v105_v9, %v43_v4  ;;  %v238_v15 = vadd.f32 %v237_v11, %v175_v6  ;;  %v59_v4 = vld [vmem:[%s486_s0 + $0x198] sm:$0xff]  ;;  %v191_v6 = vmul.f32 %v58_v0, %v58_v0 }
  0x48   :  { %v107_v17 = vadd.f32 %v106_v13, %v44_v8  ;;  %v239_v19 = vadd.f32 %v238_v15, %v176_v10  ;;  %v60_v8 = vld [vmem:[%s486_s0 + $0x1a0] sm:$0xff]  ;;  %v192_v10 = vmul.f32 %v59_v4, %v59_v4 }
  0x4a   :  { %v108_v21 = vadd.f32 %v107_v17, %v45_v12  ;;  %v240_v23 = vadd.f32 %v239_v19, %v177_v14  ;;  %v61_v12 = vld [vmem:[%s486_s0 + $0x1a8] sm:$0xff]  ;;  %v193_v14 = vmul.f32 %v60_v8, %v60_v8 }
  0x4c   :  { %v109_v25 = vadd.f32 %v108_v21, %v46_v16  ;;  %v241_v27 = vadd.f32 %v240_v23, %v178_v18  ;;  %v62_v16 = vld [vmem:[%s486_s0 + $0x1b0] sm:$0xff]  ;;  %v194_v18 = vmul.f32 %v61_v12, %v61_v12 }
  0x4e   :  { %v110_v29 = vadd.f32 %v109_v25, %v47_v20  ;;  %v242_v31 = vadd.f32 %v241_v27, %v179_v22  ;;  %v63_v20 = vld [vmem:[%s486_s0 + $0x1b8] sm:$0xff]  ;;  %v195_v22 = vmul.f32 %v62_v16, %v62_v16 }
  0x50   :  { %v111_v33 = vadd.f32 %v110_v29, %v48_v24  ;;  %v243_v35 = vadd.f32 %v242_v31, %v180_v26  ;;  %v64_v24 = vld [vmem:[%s486_s0 + $0x1c0] sm:$0xff]  ;;  %v196_v26 = vmul.f32 %v63_v20, %v63_v20 }
  0x52   :  { %v112_v37 = vadd.f32 %v111_v33, %v49_v28  ;;  %v244_v39 = vadd.f32 %v243_v35, %v181_v30  ;;  %v65_v28 = vld [vmem:[%s486_s0 + $0x1c8] sm:$0xff]  ;;  %v197_v30 = vmul.f32 %v64_v24, %v64_v24 }
  0x54   :  { %v113_v41 = vadd.f32 %v112_v37, %v50_v32  ;;  %v245_v43 = vadd.f32 %v244_v39, %v182_v34  ;;  %v66_v32 = vld [vmem:[%s486_s0 + $0x1d0] sm:$0xff]  ;;  %v198_v34 = vmul.f32 %v65_v28, %v65_v28 }
  0x56   :  { %v114_v45 = vadd.f32 %v113_v41, %v51_v36  ;;  %v246_v47 = vadd.f32 %v245_v43, %v183_v38  ;;  %v67_v36 = vld [vmem:[%s486_s0 + $0x1d8] sm:$0xff]  ;;  %v199_v38 = vmul.f32 %v66_v32, %v66_v32 }
  0x58   :  { %v115_v49 = vadd.f32 %v114_v45, %v52_v40  ;;  %v247_v51 = vadd.f32 %v246_v47, %v184_v42  ;;  %v68_v40 = vld [vmem:[%s486_s0 + $0x1e0] sm:$0xff]  ;;  %v200_v42 = vmul.f32 %v67_v36, %v67_v36 }
  0x5a   :  { %v116_v53 = vadd.f32 %v115_v49, %v53_v44  ;;  %v248_v55 = vadd.f32 %v247_v51, %v185_v46  ;;  %v69_v44 = vld [vmem:[%s486_s0 + $0x1e8] sm:$0xff]  ;;  %v201_v46 = vmul.f32 %v68_v40, %v68_v40 }
  0x5c   :  { %v117_v57 = vadd.f32 %v116_v53, %v54_v48  ;;  %v249_v59 = vadd.f32 %v248_v55, %v186_v50  ;;  %v70_v48 = vld [vmem:[%s486_s0 + $0x1f0] sm:$0xff]  ;;  %v202_v50 = vmul.f32 %v69_v44, %v69_v44 }
  0x5e   :  { %v118_v61 = vadd.f32 %v117_v57, %v55_v52  ;;  %v250_v63 = vadd.f32 %v249_v59, %v187_v54  ;;  %v71_v52 = vld [vmem:[%s486_s0 + $0x1f8] sm:$0xff]  ;;  %v203_v54 = vmul.f32 %v70_v48, %v70_v48 }
  0x5f   :  { %v204_v57 = vmul.f32 %v71_v52, %v71_v52 }
  0x60   :  { %v119_v1 = vadd.f32 %v118_v61, %v56_v56  ;;  %v251_v3 = vadd.f32 %v250_v63, %v188_v58 }
  0x62   :  { %v120_v5 = vadd.f32 %v119_v1, %v57_v60  ;;  %v252_v7 = vadd.f32 %v251_v3, %v189_v62 }
  0x64   :  { %v121_v9 = vadd.f32 %v120_v5, %v58_v0  ;;  %v253_v11 = vadd.f32 %v252_v7, %v190_v2 }
  0x66   :  { %v122_v13 = vadd.f32 %v121_v9, %v59_v4  ;;  %v254_v15 = vadd.f32 %v253_v11, %v191_v6 }
  0x68   :  { %v123_v17 = vadd.f32 %v122_v13, %v60_v8  ;;  %v255_v19 = vadd.f32 %v254_v15, %v192_v10 }
  0x6a   :  { %v124_v21 = vadd.f32 %v123_v17, %v61_v12  ;;  %v256_v23 = vadd.f32 %v255_v19, %v193_v14 }
  0x6c   :  { %v125_v25 = vadd.f32 %v124_v21, %v62_v16  ;;  %v257_v27 = vadd.f32 %v256_v23, %v194_v18 }
  0x6e   :  { %v126_v29 = vadd.f32 %v125_v25, %v63_v20  ;;  %v258_v31 = vadd.f32 %v257_v27, %v195_v22 }
  0x70   :  { %v127_v33 = vadd.f32 %v126_v29, %v64_v24  ;;  %v259_v35 = vadd.f32 %v258_v31, %v196_v26 }
  0x72   :  { %v128_v37 = vadd.f32 %v127_v33, %v65_v28  ;;  %v260_v39 = vadd.f32 %v259_v35, %v197_v30 }
  0x74   :  { %v129_v41 = vadd.f32 %v128_v37, %v66_v32  ;;  %v261_v43 = vadd.f32 %v260_v39, %v198_v34 }
  0x76   :  { %v130_v45 = vadd.f32 %v129_v41, %v67_v36  ;;  %v262_v47 = vadd.f32 %v261_v43, %v199_v38 }
  0x78   :  { %v131_v49 = vadd.f32 %v130_v45, %v68_v40  ;;  %v263_v51 = vadd.f32 %v262_v47, %v200_v42 }
  0x7a   :  { %v132_v53 = vadd.f32 %v131_v49, %v69_v44  ;;  %v264_v55 = vadd.f32 %v263_v51, %v201_v46 }
  0x7c   :  { %v133_v56 = vadd.f32 %v132_v53, %v70_v48  ;;  %v265_v58 = vadd.f32 %v264_v55, %v202_v50 }
  0x7e   :  { %v134_v59 = vadd.f32 %v133_v56, %v71_v52  ;;  %v266_v60 = vadd.f32 %v265_v58, %v203_v54 }
  0x80   :  { %v135_v61 = vrot.slane %v134_v59, 4  ;;  %v267_v62 = vadd.f32 %v266_v60, %v204_v57 }
  0x82   :  { %v136_v63 = vadd.f32 %v135_v61, %v134_v59  ;;  %v268_v0 = vrot.slane %v267_v62, 4 }
  0x84   :  { %v137_v1 = vrot.slane %v136_v63, 2  ;;  %v269_v2 = vadd.f32 %v268_v0, %v267_v62 }
  0x86   :  { %v138_v3 = vadd.f32 %v137_v1, %v136_v63  ;;  %v270_v4 = vrot.slane %v269_v2, 2 }
  0x88   :  { %v139_v5 = vrot.slane %v138_v3, 1  ;;  %v271_v6 = vadd.f32 %v270_v4, %v269_v2 }
  0x8a   :  { %v140_v7 = vadd.f32 %v139_v5, %v138_v3  ;;  %v272_v8 = vrot.slane %v271_v6, 1 }
  0x8c   :  { %v273_v9 = vadd.f32 %v272_v8, %v271_v6 }
  0x8e   :  { %v275_v10 = vsel %vm274_vm0, %v140_v7, %v273_v9 }
  0x8f   :  { %276 = vst [vmem:[%s487_s1] sm:$0x3] %v275_v10 }

// kernel: wrn_basic_block_forward.6
= control target key start
LH: loop header
LB: loop body
LE: loop exit
PB: predicated region body
PF: predicated region fallthrough
CT: control target
= control target key end

     0   :  { %s1375_s0 = inlined_call_operand.vmem [shape: f32[512,128], index: 0, kind: input, shape index: {}]   ;;  %s1376_s1 = inlined_call_operand.vmem [shape: f32[1,128], index: 1, kind: input, shape index: {}]   ;;  %s1377_s2 = inlined_call_operand.vmem [shape: f32[1,128], index: 2, kind: input, shape index: {}]   ;;  %s1378_s3 = inlined_call_operand.vmem [shape: bf16[512,128], index: 3, kind: output, shape index: {}]  }
   0x1   :  { %v14_v0 = vld [vmem:[%s1375_s0] sm:$0xff]  ;;  %v15_v1 = vld [vmem:[%s1375_s0 + $0x8] sm:$0xff]  ;;  %v16_v6 = vld [vmem:[%s1375_s0 + $0x10] sm:$0xff] }
   0x2   :  { %v958_v2 = vld [vmem:[%s1376_s1] ss:$0 sm:$0xff]  ;;  %v17_v7 = vld [vmem:[%s1375_s0 + $0x18] sm:$0xff]  ;;  %v19_v11 = vld [vmem:[%s1375_s0 + $0x28] sm:$0xff] }
   0x3   :  { %v85_v3 = vmul.f32 %v958_v2, %v14_v0  ;;  %v86_v4 = vmul.f32 %v958_v2, %v15_v1  ;;  %v965_v5 = vld [vmem:[%s1377_s2] ss:$0 sm:$0xff]  ;;  %v87_v8 = vmul.f32 %v958_v2, %v16_v6  ;;  %v88_v9 = vmul.f32 %v958_v2, %v17_v7  ;;  %v20_v12 = vld [vmem:[%s1375_s0 + $0x30] sm:$0xff]  ;;  %v21_v17 = vld [vmem:[%s1375_s0 + $0x38] sm:$0xff] }
   0x4   :  { %v18_v10 = vld [vmem:[%s1375_s0 + $0x20] sm:$0xff]  ;;  %v90_v16 = vmul.f32 %v958_v2, %v19_v11  ;;  %v91_v20 = vmul.f32 %v958_v2, %v20_v12  ;;  %v92_v21 = vmul.f32 %v958_v2, %v21_v17  ;;  %v23_v27 = vld [vmem:[%s1375_s0 + $0x48] sm:$0xff]  ;;  %v24_v32 = vld [vmem:[%s1375_s0 + $0x50] sm:$0xff] }
   0x5   :  { %v156_v13 = vadd.f32 %v965_v5, %v85_v3  ;;  %v157_v14 = vadd.f32 %v965_v5, %v86_v4  ;;  %v89_v15 = vmul.f32 %v958_v2, %v18_v10  ;;  %v158_v18 = vadd.f32 %v965_v5, %v87_v8  ;;  %v22_v22 = vld [vmem:[%s1375_s0 + $0x40] sm:$0xff]  ;;  %v25_v33 = vld [vmem:[%s1375_s0 + $0x58] sm:$0xff]  ;;  %v27_v39 = vld [vmem:[%s1375_s0 + $0x68] sm:$0xff] }
   0x6   :  { %v159_v19 = vadd.f32 %v965_v5, %v88_v9  ;;  %v161_v26 = vadd.f32 %v965_v5, %v90_v16  ;;  %v162_v30 = vadd.f32 %v965_v5, %v91_v20  ;;  %v163_v31 = vadd.f32 %v965_v5, %v92_v21  ;;  %v26_v38 = vld [vmem:[%s1375_s0 + $0x60] sm:$0xff]  ;;  %v28_v44 = vld [vmem:[%s1375_s0 + $0x70] sm:$0xff]  ;;  %v29_v49 = vld [vmem:[%s1375_s0 + $0x78] sm:$0xff] }
   0x7   :  { %v220_v23 = vmax.f32 %v156_v13, 0.0  ;;  %v221_v24 = vmax.f32 %v157_v14, 0.0  ;;  %v160_v25 = vadd.f32 %v965_v5, %v89_v15  ;;  %v222_v28 = vmax.f32 %v158_v18, 0.0  ;;  %v30_v54 = vld [vmem:[%s1375_s0 + $0x80] sm:$0xff]  ;;  %v31_v63 = vld [vmem:[%s1375_s0 + $0x88] sm:$0xff]  ;;  %v32_v6 = vld [vmem:[%s1375_s0 + $0x90] sm:$0xff] }
   0x8   :  { %v223_v29 = vmax.f32 %v159_v19, 0.0  ;;  %v225_v36 = vmax.f32 %v161_v26, 0.0  ;;  %v93_v37 = vmul.f32 %v958_v2, %v22_v22  ;;  %v226_v41 = vmax.f32 %v162_v30, 0.0  ;;  %v33_v7 = vld [vmem:[%s1375_s0 + $0x98] sm:$0xff]  ;;  %v34_v12 = vld [vmem:[%s1375_s0 + $0xa0] sm:$0xff]  ;;  %v35_v13 = vld [vmem:[%s1375_s0 + $0xa8] sm:$0xff] }
   0x9   :  { %v741_v34 = vpack.c.bf16 %v221_v24, %v220_v23  ;;  %v224_v35 = vmax.f32 %v160_v25, 0.0  ;;  %v227_v42 = vmax.f32 %v163_v31, 0.0  ;;  %v94_v43 = vmul.f32 %v958_v2, %v23_v27  ;;  %v36_v18 = vld [vmem:[%s1375_s0 + $0xb0] sm:$0xff]  ;;  %v37_v23 = vld [vmem:[%s1375_s0 + $0xb8] sm:$0xff] }
   0xa   :  { %v746_v40 = vpack.c.bf16 %v223_v29, %v222_v28  ;;  %v164_v46 = vadd.f32 %v965_v5, %v93_v37  ;;  %v95_v47 = vmul.f32 %v958_v2, %v24_v32  ;;  %v96_v48 = vmul.f32 %v958_v2, %v25_v33  ;;  %v38_v28 = vld [vmem:[%s1375_s0 + $0xc0] sm:$0xff]  ;;  %v39_v37 = vld [vmem:[%s1375_s0 + $0xc8] sm:$0xff] }
   0xb   :  { %742 = vst [vmem:[%s1378_s3] sm:$0xff] %v741_v34   ;;  %v751_v45 = vpack.c.bf16 %v225_v36, %v224_v35  ;;  %v756_v50 = vpack.c.bf16 %v227_v42, %v226_v41  ;;  %v165_v51 = vadd.f32 %v965_v5, %v94_v43  ;;  %v97_v52 = vmul.f32 %v958_v2, %v26_v38  ;;  %v40_v42 = vld [vmem:[%s1375_s0 + $0xd0] sm:$0xff]  ;;  %v41_v43 = vld [vmem:[%s1375_s0 + $0xd8] sm:$0xff] }
   0xc   :  { %898 = vst [vmem:[%s1378_s3 + $0x8] sm:$0xff] %v746_v40   ;;  %v98_v53 = vmul.f32 %v958_v2, %v27_v39  ;;  %v228_v55 = vmax.f32 %v164_v46, 0.0  ;;  %v166_v56 = vadd.f32 %v965_v5, %v95_v47  ;;  %v167_v57 = vadd.f32 %v965_v5, %v96_v48  ;;  %v42_v48 = vld [vmem:[%s1375_s0 + $0xe0] sm:$0xff] }
   0xd   :  { %899 = vst [vmem:[%s1378_s3 + $0x10] sm:$0xff] %v751_v45   ;;  %v99_v58 = vmul.f32 %v958_v2, %v28_v44  ;;  %900 = vst [vmem:[%s1378_s3 + $0x18] sm:$0xff] %v756_v50   ;;  %v229_v59 = vmax.f32 %v165_v51, 0.0  ;;  %v168_v60 = vadd.f32 %v965_v5, %v97_v52  ;;  %v100_v62 = vmul.f32 %v958_v2, %v29_v49  ;;  %v43_v49 = vld [vmem:[%s1375_s0 + $0xe8] sm:$0xff] }
   0xe   :  { %v169_v61 = vadd.f32 %v965_v5, %v98_v53  ;;  %v230_v0 = vmax.f32 %v166_v56, 0.0  ;;  %v231_v1 = vmax.f32 %v167_v57, 0.0  ;;  %v101_v4 = vmul.f32 %v958_v2, %v30_v54  ;;  %v44_v54 = vld [vmem:[%s1375_s0 + $0xf0] sm:$0xff] }
   0xf   :  { %v170_v3 = vadd.f32 %v965_v5, %v99_v58  ;;  %v761_v8 = vpack.c.bf16 %v229_v59, %v228_v55  ;;  %v232_v9 = vmax.f32 %v168_v60, 0.0  ;;  %v171_v11 = vadd.f32 %v965_v5, %v100_v62  ;;  %v45_v59 = vld [vmem:[%s1375_s0 + $0xf8] sm:$0xff] }
  0x10   :  { %v233_v10 = vmax.f32 %v169_v61, 0.0  ;;  %v766_v14 = vpack.c.bf16 %v231_v1, %v230_v0  ;;  %v102_v16 = vmul.f32 %v958_v2, %v31_v63  ;;  %v172_v17 = vadd.f32 %v965_v5, %v101_v4  ;;  %v46_v0 = vld [vmem:[%s1375_s0 + $0x100] sm:$0xff] }
  0x11   :  { %v234_v15 = vmax.f32 %v170_v3, 0.0  ;;  %901 = vst [vmem:[%s1378_s3 + $0x20] sm:$0xff] %v761_v8   ;;  %v235_v20 = vmax.f32 %v171_v11, 0.0  ;;  %v103_v21 = vmul.f32 %v958_v2, %v32_v6  ;;  %v104_v22 = vmul.f32 %v958_v2, %v33_v7  ;;  %v47_v11 = vld [vmem:[%s1375_s0 + $0x108] sm:$0xff] }
  0x12   :  { %v771_v19 = vpack.c.bf16 %v233_v10, %v232_v9  ;;  %902 = vst [vmem:[%s1378_s3 + $0x28] sm:$0xff] %v766_v14   ;;  %v173_v24 = vadd.f32 %v965_v5, %v102_v16  ;;  %v236_v25 = vmax.f32 %v172_v17, 0.0  ;;  %v105_v26 = vmul.f32 %v958_v2, %v34_v12  ;;  %v48_v16 = vld [vmem:[%s1375_s0 + $0x110] sm:$0xff]  ;;  %v49_v17 = vld [vmem:[%s1375_s0 + $0x118] sm:$0xff] }
  0x13   :  { %v106_v27 = vmul.f32 %v958_v2, %v35_v13  ;;  %v776_v29 = vpack.c.bf16 %v235_v20, %v234_v15  ;;  %v174_v30 = vadd.f32 %v965_v5, %v103_v21  ;;  %v175_v31 = vadd.f32 %v965_v5, %v104_v22  ;;  %v50_v22 = vld [vmem:[%s1375_s0 + $0x120] sm:$0xff] }
  0x14   :  { %903 = vst [vmem:[%s1378_s3 + $0x30] sm:$0xff] %v771_v19   ;;  %v107_v32 = vmul.f32 %v958_v2, %v36_v18  ;;  %v237_v33 = vmax.f32 %v173_v24, 0.0  ;;  %v176_v34 = vadd.f32 %v965_v5, %v105_v26  ;;  %v108_v36 = vmul.f32 %v958_v2, %v37_v23  ;;  %v51_v23 = vld [vmem:[%s1375_s0 + $0x128] sm:$0xff] }
  0x15   :  { %v177_v35 = vadd.f32 %v965_v5, %v106_v27  ;;  %904 = vst [vmem:[%s1378_s3 + $0x38] sm:$0xff] %v776_v29   ;;  %v238_v38 = vmax.f32 %v174_v30, 0.0  ;;  %v239_v39 = vmax.f32 %v175_v31, 0.0  ;;  %v109_v41 = vmul.f32 %v958_v2, %v38_v28  ;;  %v52_v28 = vld [vmem:[%s1375_s0 + $0x130] sm:$0xff] }
  0x16   :  { %v178_v40 = vadd.f32 %v965_v5, %v107_v32  ;;  %v781_v44 = vpack.c.bf16 %v237_v33, %v236_v25  ;;  %v240_v45 = vmax.f32 %v176_v34, 0.0  ;;  %v179_v47 = vadd.f32 %v965_v5, %v108_v36  ;;  %v53_v33 = vld [vmem:[%s1375_s0 + $0x138] sm:$0xff] }
  0x17   :  { %v241_v46 = vmax.f32 %v177_v35, 0.0  ;;  %v786_v50 = vpack.c.bf16 %v239_v39, %v238_v38  ;;  %v110_v52 = vmul.f32 %v958_v2, %v39_v37  ;;  %v180_v53 = vadd.f32 %v965_v5, %v109_v41  ;;  %v54_v38 = vld [vmem:[%s1375_s0 + $0x140] sm:$0xff] }
  0x18   :  { %v242_v51 = vmax.f32 %v178_v40, 0.0  ;;  %905 = vst [vmem:[%s1378_s3 + $0x40] sm:$0xff] %v781_v44   ;;  %v243_v56 = vmax.f32 %v179_v47, 0.0  ;;  %v111_v57 = vmul.f32 %v958_v2, %v40_v42  ;;  %v112_v58 = vmul.f32 %v958_v2, %v41_v43  ;;  %v55_v47 = vld [vmem:[%s1375_s0 + $0x148] sm:$0xff] }
  0x19   :  { %v791_v55 = vpack.c.bf16 %v241_v46, %v240_v45  ;;  %906 = vst [vmem:[%s1378_s3 + $0x48] sm:$0xff] %v786_v50   ;;  %v181_v60 = vadd.f32 %v965_v5, %v110_v52  ;;  %v244_v61 = vmax.f32 %v180_v53, 0.0  ;;  %v113_v62 = vmul.f32 %v958_v2, %v42_v48  ;;  %v56_v52 = vld [vmem:[%s1375_s0 + $0x150] sm:$0xff]  ;;  %v57_v53 = vld [vmem:[%s1375_s0 + $0x158] sm:$0xff] }
  0x1a   :  { %v114_v63 = vmul.f32 %v958_v2, %v43_v49  ;;  %v796_v1 = vpack.c.bf16 %v243_v56, %v242_v51  ;;  %v182_v3 = vadd.f32 %v965_v5, %v111_v57  ;;  %v183_v4 = vadd.f32 %v965_v5, %v112_v58  ;;  %v58_v58 = vld [vmem:[%s1375_s0 + $0x160] sm:$0xff] }
  0x1b   :  { %907 = vst [vmem:[%s1378_s3 + $0x50] sm:$0xff] %v791_v55   ;;  %v115_v6 = vmul.f32 %v958_v2, %v44_v54  ;;  %v245_v7 = vmax.f32 %v181_v60, 0.0  ;;  %v184_v8 = vadd.f32 %v965_v5, %v113_v62  ;;  %v116_v10 = vmul.f32 %v958_v2, %v45_v59  ;;  %v59_v59 = vld [vmem:[%s1375_s0 + $0x168] sm:$0xff] }
  0x1c   :  { %v185_v9 = vadd.f32 %v965_v5, %v114_v63  ;;  %908 = vst [vmem:[%s1378_s3 + $0x58] sm:$0xff] %v796_v1   ;;  %v246_v12 = vmax.f32 %v182_v3, 0.0  ;;  %v247_v13 = vmax.f32 %v183_v4, 0.0  ;;  %v117_v15 = vmul.f32 %v958_v2, %v46_v0  ;;  %v60_v0 = vld [vmem:[%s1375_s0 + $0x170] sm:$0xff] }
  0x1d   :  { %v186_v14 = vadd.f32 %v965_v5, %v115_v6  ;;  %v801_v18 = vpack.c.bf16 %v245_v7, %v244_v61  ;;  %v248_v19 = vmax.f32 %v184_v8, 0.0  ;;  %v187_v21 = vadd.f32 %v965_v5, %v116_v10  ;;  %v61_v7 = vld [vmem:[%s1375_s0 + $0x178] sm:$0xff] }
  0x1e   :  { %v249_v20 = vmax.f32 %v185_v9, 0.0  ;;  %v806_v24 = vpack.c.bf16 %v247_v13, %v246_v12  ;;  %v118_v26 = vmul.f32 %v958_v2, %v47_v11  ;;  %v188_v27 = vadd.f32 %v965_v5, %v117_v15  ;;  %v62_v12 = vld [vmem:[%s1375_s0 + $0x180] sm:$0xff] }
  0x1f   :  { %v250_v25 = vmax.f32 %v186_v14, 0.0  ;;  %909 = vst [vmem:[%s1378_s3 + $0x60] sm:$0xff] %v801_v18   ;;  %v251_v30 = vmax.f32 %v187_v21, 0.0  ;;  %v119_v31 = vmul.f32 %v958_v2, %v48_v16  ;;  %v120_v32 = vmul.f32 %v958_v2, %v49_v17  ;;  %v63_v21 = vld [vmem:[%s1375_s0 + $0x188] sm:$0xff] }
  0x20   :  { %v811_v29 = vpack.c.bf16 %v249_v20, %v248_v19  ;;  %910 = vst [vmem:[%s1378_s3 + $0x68] sm:$0xff] %v806_v24   ;;  %v189_v34 = vadd.f32 %v965_v5, %v118_v26  ;;  %v252_v35 = vmax.f32 %v188_v27, 0.0  ;;  %v121_v36 = vmul.f32 %v958_v2, %v50_v22  ;;  %v64_v26 = vld [vmem:[%s1375_s0 + $0x190] sm:$0xff]  ;;  %v65_v27 = vld [vmem:[%s1375_s0 + $0x198] sm:$0xff] }
  0x21   :  { %v122_v37 = vmul.f32 %v958_v2, %v51_v23  ;;  %v816_v39 = vpack.c.bf16 %v251_v30, %v250_v25  ;;  %v190_v40 = vadd.f32 %v965_v5, %v119_v31  ;;  %v191_v41 = vadd.f32 %v965_v5, %v120_v32  ;;  %v66_v32 = vld [vmem:[%s1375_s0 + $0x1a0] sm:$0xff] }
  0x22   :  { %911 = vst [vmem:[%s1378_s3 + $0x70] sm:$0xff] %v811_v29   ;;  %v123_v42 = vmul.f32 %v958_v2, %v52_v28  ;;  %v253_v43 = vmax.f32 %v189_v34, 0.0  ;;  %v192_v44 = vadd.f32 %v965_v5, %v121_v36  ;;  %v124_v46 = vmul.f32 %v958_v2, %v53_v33  ;;  %v67_v33 = vld [vmem:[%s1375_s0 + $0x1a8] sm:$0xff] }
  0x23   :  { %v193_v45 = vadd.f32 %v965_v5, %v122_v37  ;;  %912 = vst [vmem:[%s1378_s3 + $0x78] sm:$0xff] %v816_v39   ;;  %v254_v48 = vmax.f32 %v190_v40, 0.0  ;;  %v255_v49 = vmax.f32 %v191_v41, 0.0  ;;  %v125_v51 = vmul.f32 %v958_v2, %v54_v38  ;;  %v68_v38 = vld [vmem:[%s1375_s0 + $0x1b0] sm:$0xff] }
  0x24   :  { %v194_v50 = vadd.f32 %v965_v5, %v123_v42  ;;  %v821_v54 = vpack.c.bf16 %v253_v43, %v252_v35  ;;  %v256_v55 = vmax.f32 %v192_v44, 0.0  ;;  %v195_v57 = vadd.f32 %v965_v5, %v124_v46  ;;  %v69_v43 = vld [vmem:[%s1375_s0 + $0x1b8] sm:$0xff] }
  0x25   :  { %v257_v56 = vmax.f32 %v193_v45, 0.0  ;;  %v826_v60 = vpack.c.bf16 %v255_v49, %v254_v48  ;;  %v126_v62 = vmul.f32 %v958_v2, %v55_v47  ;;  %v196_v63 = vadd.f32 %v965_v5, %v125_v51  ;;  %v70_v48 = vld [vmem:[%s1375_s0 + $0x1c0] sm:$0xff] }
  0x26   :  { %v258_v61 = vmax.f32 %v194_v50, 0.0  ;;  %913 = vst [vmem:[%s1378_s3 + $0x80] sm:$0xff] %v821_v54   ;;  %v259_v3 = vmax.f32 %v195_v57, 0.0  ;;  %v127_v4 = vmul.f32 %v958_v2, %v56_v52  ;;  %v128_v6 = vmul.f32 %v958_v2, %v57_v53  ;;  %v71_v57 = vld [vmem:[%s1375_s0 + $0x1c8] sm:$0xff] }
  0x27   :  { %v831_v1 = vpack.c.bf16 %v257_v56, %v256_v55  ;;  %914 = vst [vmem:[%s1378_s3 + $0x88] sm:$0xff] %v826_v60   ;;  %v197_v8 = vadd.f32 %v965_v5, %v126_v62  ;;  %v260_v9 = vmax.f32 %v196_v63, 0.0  ;;  %v129_v10 = vmul.f32 %v958_v2, %v58_v58  ;;  %v72_v62 = vld [vmem:[%s1375_s0 + $0x1d0] sm:$0xff]  ;;  %v73_v63 = vld [vmem:[%s1375_s0 + $0x1d8] sm:$0xff] }
  0x28   :  { %v130_v11 = vmul.f32 %v958_v2, %v59_v59  ;;  %v836_v13 = vpack.c.bf16 %v259_v3, %v258_v61  ;;  %v198_v14 = vadd.f32 %v965_v5, %v127_v4  ;;  %v199_v15 = vadd.f32 %v965_v5, %v128_v6  ;;  %v74_v6 = vld [vmem:[%s1375_s0 + $0x1e0] sm:$0xff] }
  0x29   :  { %915 = vst [vmem:[%s1378_s3 + $0x90] sm:$0xff] %v831_v1   ;;  %v131_v16 = vmul.f32 %v958_v2, %v60_v0  ;;  %v261_v17 = vmax.f32 %v197_v8, 0.0  ;;  %v200_v18 = vadd.f32 %v965_v5, %v129_v10  ;;  %v132_v20 = vmul.f32 %v958_v2, %v61_v7  ;;  %v75_v7 = vld [vmem:[%s1375_s0 + $0x1e8] sm:$0xff] }
  0x2a   :  { %v201_v19 = vadd.f32 %v965_v5, %v130_v11  ;;  %916 = vst [vmem:[%s1378_s3 + $0x98] sm:$0xff] %v836_v13   ;;  %v262_v22 = vmax.f32 %v198_v14, 0.0  ;;  %v263_v23 = vmax.f32 %v199_v15, 0.0  ;;  %v133_v25 = vmul.f32 %v958_v2, %v62_v12  ;;  %v76_v12 = vld [vmem:[%s1375_s0 + $0x1f0] sm:$0xff] }
  0x2b   :  { %v202_v24 = vadd.f32 %v965_v5, %v131_v16  ;;  %v841_v28 = vpack.c.bf16 %v261_v17, %v260_v9  ;;  %v264_v29 = vmax.f32 %v200_v18, 0.0  ;;  %v203_v31 = vadd.f32 %v965_v5, %v132_v20  ;;  %v77_v17 = vld [vmem:[%s1375_s0 + $0x1f8] sm:$0xff] }
  0x2c   :  { %v265_v30 = vmax.f32 %v201_v19, 0.0  ;;  %v846_v34 = vpack.c.bf16 %v263_v23, %v262_v22  ;;  %v134_v36 = vmul.f32 %v958_v2, %v63_v21  ;;  %v204_v37 = vadd.f32 %v965_v5, %v133_v25 }
  0x2d   :  { %v266_v35 = vmax.f32 %v202_v24, 0.0  ;;  %917 = vst [vmem:[%s1378_s3 + $0xa0] sm:$0xff] %v841_v28   ;;  %v267_v40 = vmax.f32 %v203_v31, 0.0  ;;  %v135_v41 = vmul.f32 %v958_v2, %v64_v26  ;;  %v136_v42 = vmul.f32 %v958_v2, %v65_v27 }
  0x2e   :  { %v851_v39 = vpack.c.bf16 %v265_v30, %v264_v29  ;;  %918 = vst [vmem:[%s1378_s3 + $0xa8] sm:$0xff] %v846_v34   ;;  %v205_v44 = vadd.f32 %v965_v5, %v134_v36  ;;  %v268_v45 = vmax.f32 %v204_v37, 0.0  ;;  %v137_v46 = vmul.f32 %v958_v2, %v66_v32 }
  0x2f   :  { %v138_v47 = vmul.f32 %v958_v2, %v67_v33  ;;  %v856_v49 = vpack.c.bf16 %v267_v40, %v266_v35  ;;  %v206_v50 = vadd.f32 %v965_v5, %v135_v41  ;;  %v207_v51 = vadd.f32 %v965_v5, %v136_v42 }
  0x30   :  { %919 = vst [vmem:[%s1378_s3 + $0xb0] sm:$0xff] %v851_v39   ;;  %v139_v52 = vmul.f32 %v958_v2, %v68_v38  ;;  %v269_v53 = vmax.f32 %v205_v44, 0.0  ;;  %v208_v54 = vadd.f32 %v965_v5, %v137_v46  ;;  %v140_v56 = vmul.f32 %v958_v2, %v69_v43 }
  0x31   :  { %v209_v55 = vadd.f32 %v965_v5, %v138_v47  ;;  %920 = vst [vmem:[%s1378_s3 + $0xb8] sm:$0xff] %v856_v49   ;;  %v270_v58 = vmax.f32 %v206_v50, 0.0  ;;  %v271_v59 = vmax.f32 %v207_v51, 0.0  ;;  %v141_v61 = vmul.f32 %v958_v2, %v70_v48 }
  0x32   :  { %v210_v60 = vadd.f32 %v965_v5, %v139_v52  ;;  %v861_v0 = vpack.c.bf16 %v269_v53, %v268_v45  ;;  %v272_v1 = vmax.f32 %v208_v54, 0.0  ;;  %v211_v4 = vadd.f32 %v965_v5, %v140_v56 }
  0x33   :  { %v273_v3 = vmax.f32 %v209_v55, 0.0  ;;  %v866_v8 = vpack.c.bf16 %v271_v59, %v270_v58  ;;  %v142_v10 = vmul.f32 %v958_v2, %v71_v57  ;;  %v212_v11 = vadd.f32 %v965_v5, %v141_v61 }
  0x34   :  { %v274_v9 = vmax.f32 %v210_v60, 0.0  ;;  %921 = vst [vmem:[%s1378_s3 + $0xc0] sm:$0xff] %v861_v0   ;;  %v275_v14 = vmax.f32 %v211_v4, 0.0  ;;  %v143_v15 = vmul.f32 %v958_v2, %v72_v62  ;;  %v144_v16 = vmul.f32 %v958_v2, %v73_v63 }
  0x35   :  { %v871_v13 = vpack.c.bf16 %v273_v3, %v272_v1  ;;  %922 = vst [vmem:[%s1378_s3 + $0xc8] sm:$0xff] %v866_v8   ;;  %v213_v18 = vadd.f32 %v965_v5, %v142_v10  ;;  %v276_v19 = vmax.f32 %v212_v11, 0.0  ;;  %v145_v20 = vmul.f32 %v958_v2, %v74_v6 }
  0x36   :  { %v146_v21 = vmul.f32 %v958_v2, %v75_v7  ;;  %v876_v22 = vpack.c.bf16 %v275_v14, %v274_v9  ;;  %v214_v23 = vadd.f32 %v965_v5, %v143_v15  ;;  %v215_v24 = vadd.f32 %v965_v5, %v144_v16 }
  0x37   :  { %923 = vst [vmem:[%s1378_s3 + $0xd0] sm:$0xff] %v871_v13   ;;  %v147_v25 = vmul.f32 %v958_v2, %v76_v12  ;;  %v277_v26 = vmax.f32 %v213_v18, 0.0  ;;  %v216_v27 = vadd.f32 %v965_v5, %v145_v20  ;;  %v148_v29 = vmul.f32 %v958_v2, %v77_v17 }
  0x38   :  { %v217_v28 = vadd.f32 %v965_v5, %v146_v21  ;;  %924 = vst [vmem:[%s1378_s3 + $0xd8] sm:$0xff] %v876_v22   ;;  %v278_v30 = vmax.f32 %v214_v23, 0.0  ;;  %v279_v31 = vmax.f32 %v215_v24, 0.0 }
  0x39   :  { %v218_v32 = vadd.f32 %v965_v5, %v147_v25  ;;  %v881_v33 = vpack.c.bf16 %v277_v26, %v276_v19  ;;  %v280_v34 = vmax.f32 %v216_v27, 0.0  ;;  %v219_v36 = vadd.f32 %v965_v5, %v148_v29 }
  0x3a   :  { %v281_v35 = vmax.f32 %v217_v28, 0.0  ;;  %v886_v37 = vpack.c.bf16 %v279_v31, %v278_v30 }
  0x3b   :  { %v282_v38 = vmax.f32 %v218_v32, 0.0  ;;  %925 = vst [vmem:[%s1378_s3 + $0xe0] sm:$0xff] %v881_v33   ;;  %v283_v39 = vmax.f32 %v219_v36, 0.0 }
  0x3c   :  { %v891_v2 = vpack.c.bf16 %v281_v35, %v280_v34  ;;  %926 = vst [vmem:[%s1378_s3 + $0xe8] sm:$0xff] %v886_v37  }
  0x3d   :  { %v896_v40 = vpack.c.bf16 %v283_v39, %v282_v38 }
  0x3e   :  { %927 = vst [vmem:[%s1378_s3 + $0xf0] sm:$0xff] %v891_v2  }
  0x3f   :  { %928 = vst [vmem:[%s1378_s3 + $0xf8] sm:$0xff] %v896_v40  }

// kernel: wrn_basic_block_forward.8
= control target key start
LH: loop header
LB: loop body
LE: loop exit
PB: predicated region body
PF: predicated region fallthrough
CT: control target
= control target key end

     0   :  { %s422_s0 = inlined_call_operand.vmem [shape: bf16[128,128], index: 0, kind: input, shape index: {}]   ;;  %s423_s1 = inlined_call_operand.vmem [shape: f32[1,128], index: 1, kind: input, shape index: {}]   ;;  %s424_s2 = inlined_call_operand.vmem [shape: f32[1,128], index: 2, kind: input, shape index: {}]   ;;  %s425_s3 = inlined_call_operand.vmem [shape: bf16[128,128], index: 3, kind: output, shape index: {}]  }
   0x1   :  { %v227_v0 = vld [vmem:[%s422_s0] sm:$0xff]   ;;  %v298_v4 = vld [vmem:[%s422_s0 + $0x8] sm:$0xff]   ;;  %v299_v5 = vld [vmem:[%s422_s0 + $0x10] sm:$0xff]  }
   0x2   :  { %v338_v1 = vld [vmem:[%s423_s1] ss:$0 sm:$0xff]  ;;  %v228_v2 = vunpack.c.l.bf16 %v227_v0  ;;  %v229_v3 = vunpack.c.h.bf16 %v227_v0  ;;  %v300_v6 = vld [vmem:[%s422_s0 + $0x18] sm:$0xff]   ;;  %v232_v8 = vunpack.c.l.bf16 %v298_v4  ;;  %v233_v9 = vunpack.c.h.bf16 %v298_v4  ;;  %v302_v33 = vld [vmem:[%s422_s0 + $0x28] sm:$0xff]  }
   0x3   :  { %v352_v7 = vld [vmem:[%s424_s2] ss:$0 sm:$0xff]  ;;  %v236_v10 = vunpack.c.l.bf16 %v299_v5  ;;  %v237_v11 = vunpack.c.h.bf16 %v299_v5  ;;  %v240_v14 = vunpack.c.l.bf16 %v300_v6  ;;  %v241_v15 = vunpack.c.h.bf16 %v300_v6  ;;  %v303_v38 = vld [vmem:[%s422_s0 + $0x30] sm:$0xff]   ;;  %v304_v43 = vld [vmem:[%s422_s0 + $0x38] sm:$0xff]  }
   0x4   :  { %v53_v12 = vmul.f32 %v228_v2, %v338_v1  ;;  %v54_v13 = vmul.f32 %v229_v3, %v338_v1  ;;  %v55_v16 = vmul.f32 %v232_v8, %v338_v1  ;;  %v56_v17 = vmul.f32 %v233_v9, %v338_v1  ;;  %v301_v28 = vld [vmem:[%s422_s0 + $0x20] sm:$0xff]  }
   0x5   :  { %v57_v18 = vmul.f32 %v236_v10, %v338_v1  ;;  %v58_v19 = vmul.f32 %v237_v11, %v338_v1  ;;  %v59_v22 = vmul.f32 %v240_v14, %v338_v1  ;;  %v60_v23 = vmul.f32 %v241_v15, %v338_v1 }
   0x6   :  { %v76_v20 = vadd.f32 %v352_v7, %v53_v12  ;;  %v77_v21 = vadd.f32 %v352_v7, %v54_v13  ;;  %v78_v24 = vadd.f32 %v352_v7, %v55_v16  ;;  %v79_v25 = vadd.f32 %v352_v7, %v56_v17 }
   0x7   :  { %v80_v26 = vadd.f32 %v352_v7, %v57_v18  ;;  %v81_v27 = vadd.f32 %v352_v7, %v58_v19  ;;  %v82_v31 = vadd.f32 %v352_v7, %v59_v22  ;;  %v83_v32 = vadd.f32 %v352_v7, %v60_v23 }
   0x8   :  { %v92_v29 = vmax.f32 %v76_v20, 0.0  ;;  %v93_v30 = vmax.f32 %v77_v21, 0.0  ;;  %v94_v34 = vmax.f32 %v78_v24, 0.0  ;;  %v95_v35 = vmax.f32 %v79_v25, 0.0 }
   0x9   :  { %v96_v36 = vmax.f32 %v80_v26, 0.0  ;;  %v97_v37 = vmax.f32 %v81_v27, 0.0  ;;  %v98_v40 = vmax.f32 %v82_v31, 0.0  ;;  %v99_v41 = vmax.f32 %v83_v32, 0.0 }
   0xa   :  { %v261_v39 = vpack.c.bf16 %v93_v30, %v92_v29  ;;  %v244_v42 = vunpack.c.l.bf16 %v301_v28  ;;  %v266_v44 = vpack.c.bf16 %v95_v35, %v94_v34  ;;  %v245_v46 = vunpack.c.h.bf16 %v301_v28 }
   0xb   :  { %v271_v45 = vpack.c.bf16 %v97_v37, %v96_v36  ;;  %v248_v47 = vunpack.c.l.bf16 %v302_v33  ;;  %v276_v48 = vpack.c.bf16 %v99_v41, %v98_v40  ;;  %v249_v50 = vunpack.c.h.bf16 %v302_v33 }
   0xc   :  { %262 = vst [vmem:[%s425_s3] sm:$0xff] %v261_v39   ;;  %v61_v49 = vmul.f32 %v244_v42, %v338_v1  ;;  %v252_v51 = vunpack.c.l.bf16 %v303_v38  ;;  %305 = vst [vmem:[%s425_s3 + $0x8] sm:$0xff] %v266_v44   ;;  %v62_v52 = vmul.f32 %v245_v46, %v338_v1  ;;  %v253_v54 = vunpack.c.h.bf16 %v303_v38 }
   0xd   :  { %306 = vst [vmem:[%s425_s3 + $0x10] sm:$0xff] %v271_v45   ;;  %v63_v53 = vmul.f32 %v248_v47, %v338_v1  ;;  %v256_v55 = vunpack.c.l.bf16 %v304_v43  ;;  %307 = vst [vmem:[%s425_s3 + $0x18] sm:$0xff] %v276_v48   ;;  %v64_v57 = vmul.f32 %v249_v50, %v338_v1  ;;  %v257_v59 = vunpack.c.h.bf16 %v304_v43 }
   0xe   :  { %v84_v56 = vadd.f32 %v352_v7, %v61_v49  ;;  %v65_v58 = vmul.f32 %v252_v51, %v338_v1  ;;  %v85_v60 = vadd.f32 %v352_v7, %v62_v52  ;;  %v66_v62 = vmul.f32 %v253_v54, %v338_v1 }
   0xf   :  { %v86_v61 = vadd.f32 %v352_v7, %v63_v53  ;;  %v67_v63 = vmul.f32 %v256_v55, %v338_v1  ;;  %v87_v2 = vadd.f32 %v352_v7, %v64_v57  ;;  %v68_v4 = vmul.f32 %v257_v59, %v338_v1 }
  0x10   :  { %v100_v0 = vmax.f32 %v84_v56, 0.0  ;;  %v88_v3 = vadd.f32 %v352_v7, %v65_v58  ;;  %v101_v5 = vmax.f32 %v85_v60, 0.0  ;;  %v89_v8 = vadd.f32 %v352_v7, %v66_v62 }
  0x11   :  { %v102_v6 = vmax.f32 %v86_v61, 0.0  ;;  %v90_v9 = vadd.f32 %v352_v7, %v67_v63  ;;  %v103_v10 = vmax.f32 %v87_v2, 0.0  ;;  %v91_v12 = vadd.f32 %v352_v7, %v68_v4 }
  0x12   :  { %v104_v11 = vmax.f32 %v88_v3, 0.0  ;;  %v281_v13 = vpack.c.bf16 %v101_v5, %v100_v0  ;;  %v105_v14 = vmax.f32 %v89_v8, 0.0 }
  0x13   :  { %v106_v15 = vmax.f32 %v90_v9, 0.0  ;;  %v286_v16 = vpack.c.bf16 %v103_v10, %v102_v6  ;;  %v107_v17 = vmax.f32 %v91_v12, 0.0 }
  0x14   :  { %308 = vst [vmem:[%s425_s3 + $0x20] sm:$0xff] %v281_v13   ;;  %v291_v1 = vpack.c.bf16 %v105_v14, %v104_v11 }
  0x15   :  { %309 = vst [vmem:[%s425_s3 + $0x28] sm:$0xff] %v286_v16   ;;  %v296_v18 = vpack.c.bf16 %v107_v17, %v106_v15 }
  0x16   :  { %310 = vst [vmem:[%s425_s3 + $0x30] sm:$0xff] %v291_v1  }
  0x17   :  { %311 = vst [vmem:[%s425_s3 + $0x38] sm:$0xff] %v296_v18  }

// kernel: wrn_basic_block_forward.7
= control target key start
LH: loop header
LB: loop body
LE: loop exit
PB: predicated region body
PF: predicated region fallthrough
CT: control target
= control target key end

     0   :  { %vm377_vm0 = vcmask 1040384   ;;  %s658_s1 = inlined_call_operand.vmem [shape: bf16[128,128], index: 1, kind: input, shape index: {}]   ;;  %s659_s0 = inlined_call_operand.vmem [shape: bf16[128,128], index: 0, kind: input, shape index: {}]   ;;  %s660_s2 = inlined_call_operand.vmem [shape: bf16[128,128], index: 2, kind: output, shape index: {0}]   ;;  %s661_s3 = inlined_call_operand.vmem [shape: f32[1,2,128], index: 3, kind: output, shape index: {1}]  }
   0x1   :  { %v547_v0 = vld [vmem:[%s658_s1] sm:$0xff]   ;;  %v548_v1 = vld [vmem:[%s658_s1 + $0x8] sm:$0xff]   ;;  %v549_v2 = vld [vmem:[%s658_s1 + $0x10] sm:$0xff]  }
   0x2   :  { %499 = vmatprep.subr.bf16.mxu0 %v547_v0  ;;  %531 = vmatprep.subr.bf16.mxu1 %v547_v0  ;;  %v550_v3 = vld [vmem:[%s658_s1 + $0x18] sm:$0xff]   ;;  %v555_v4 = vld [vmem:[%s659_s0] sm:$0xff]   ;;  %v552_v7 = vld [vmem:[%s658_s1 + $0x28] sm:$0xff]  }
   0x3   :  { %500 = vmatpush3.bf16.msra.mxu0 %v547_v0  ;;  %539 = vmatpush3.bf16.msra.mxu1 %v547_v0  ;;  %v551_v5 = vld [vmem:[%s658_s1 + $0x20] sm:$0xff]   ;;  %v553_v8 = vld [vmem:[%s658_s1 + $0x30] sm:$0xff]   ;;  %v554_v9 = vld [vmem:[%s658_s1 + $0x38] sm:$0xff]  }
   0x4   :  { %501 = vmatprep.subr.bf16.mxu0 %v548_v1  ;;  %532 = vmatprep.subr.bf16.mxu1 %v548_v1  ;;  %v559_v6 = vld [vmem:[%s659_s0 + $0x20] sm:$0xff]   ;;  %v556_v10 = vld [vmem:[%s659_s0 + $0x8] sm:$0xff]   ;;  %v557_v12 = vld [vmem:[%s659_s0 + $0x10] sm:$0xff]  }
   0x5   :  { %515 = vmatprep.mubr.bf16.mxu0 %v555_v4  ;;  %523 = vmatprep.mubr.bf16.mxu1 %v559_v6  ;;  %v560_v11 = vld [vmem:[%s659_s0 + $0x28] sm:$0xff]   ;;  %v561_v13 = vld [vmem:[%s659_s0 + $0x30] sm:$0xff]   ;;  %v558_v14 = vld [vmem:[%s659_s0 + $0x18] sm:$0xff]  }
   0x6   :  { %v562_v15 = vld [vmem:[%s659_s0 + $0x38] sm:$0xff]  }
   0x7   :  { %502 = vmatpush3.bf16.msra.mxu0 %v548_v1  ;;  %540 = vmatpush3.bf16.msra.mxu1 %v548_v1 }
   0x8   :  { %503 = vmatprep.subr.bf16.mxu0 %v549_v2  ;;  %533 = vmatprep.subr.bf16.mxu1 %v549_v2 }
   0xb   :  { %504 = vmatpush3.bf16.msra.mxu0 %v549_v2  ;;  %541 = vmatpush3.bf16.msra.mxu1 %v549_v2 }
   0xc   :  { %505 = vmatprep.subr.bf16.mxu0 %v550_v3  ;;  %534 = vmatprep.subr.bf16.mxu1 %v550_v3 }
   0xf   :  { %506 = vmatpush3.bf16.msra.mxu0 %v550_v3  ;;  %542 = vmatpush3.bf16.msra.mxu1 %v550_v3 }
  0x10   :  { %507 = vmatprep.subr.bf16.mxu0 %v551_v5  ;;  %535 = vmatprep.subr.bf16.mxu1 %v551_v5 }
  0x13   :  { %508 = vmatpush3.bf16.msra.mxu0 %v551_v5  ;;  %543 = vmatpush3.bf16.msra.mxu1 %v551_v5 }
  0x14   :  { %509 = vmatprep.subr.bf16.mxu0 %v552_v7  ;;  %536 = vmatprep.subr.bf16.mxu1 %v552_v7 }
  0x17   :  { %510 = vmatpush3.bf16.msra.mxu0 %v552_v7  ;;  %544 = vmatpush3.bf16.msra.mxu1 %v552_v7 }
  0x18   :  { %511 = vmatprep.subr.bf16.mxu0 %v553_v8  ;;  %537 = vmatprep.subr.bf16.mxu1 %v553_v8 }
  0x1b   :  { %512 = vmatpush3.bf16.msra.mxu0 %v553_v8  ;;  %545 = vmatpush3.bf16.msra.mxu1 %v553_v8 }
  0x1c   :  { %513 = vmatprep.subr.bf16.mxu0 %v554_v9  ;;  %538 = vmatprep.subr.bf16.mxu1 %v554_v9 }
  0x1f   :  { %514 = vmatpush3.bf16.msra.mxu0 %v554_v9  ;;  %546 = vmatpush3.bf16.msra.mxu1 %v554_v9 }
  0x22   :  { %516 = vmatmul.mubr.bf16.vlgmr.msra.gmra.mrb[0].mxu0 %v556_v10  ;;  %524 = vmatmul.mubr.bf16.vlgmr.msra.gmra.mrb[0].mxu1 %v560_v11 }
  0x23   :  { %519 = vmatprep.mubr.bf16.mxu0 %v557_v12  ;;  %527 = vmatprep.mubr.bf16.mxu1 %v561_v13 }
  0x2a   :  { %520 = vmatmul.mubr.bf16.gmra.mrb[4].mxu0 %v558_v14  ;;  %528 = vmatmul.mubr.bf16.gmra.mrb[4].mxu1 %v562_v15 }
  0xf5   :  { %v517_v16 = vpop.f32.mrb[0].mxu0  ;;  %v525_v17 = vpop.f32.mrb[0].mxu1 }
  0xf6   :  { %v176_v18 = vpop.f32.mrb[1].mxu0  ;;  %v208_v19 = vpop.f32.mrb[1].mxu1  ;;  %v342_v31 = vmul.f32 %v517_v16, %v517_v16  ;;  %v350_v3 = vmul.f32 %v525_v17, %v525_v17 }
  0xf7   :  { %v518_v20 = vpop.f32.mrb[2].mxu0  ;;  %v526_v21 = vpop.f32.mrb[2].mxu1  ;;  %v340_v22 = vmul.f32 %v176_v18, %v176_v18  ;;  %v348_v61 = vmul.f32 %v208_v19, %v208_v19 }
  0xf8   :  { %v444_v23 = vpack.c.bf16 %v518_v20, %v517_v16  ;;  %v179_v24 = vpop.f32.mrb[3].mxu0  ;;  %v464_v25 = vpack.c.bf16 %v526_v21, %v525_v17  ;;  %v211_v26 = vpop.f32.mrb[3].mxu1  ;;  %v343_v34 = vmul.f32 %v518_v20, %v518_v20  ;;  %v351_v6 = vmul.f32 %v526_v21, %v526_v21 }
  0xf9   :  { %v439_v27 = vpack.c.bf16 %v179_v24, %v176_v18  ;;  %v319_v28 = vadd.f32 %v179_v24, %v176_v18  ;;  %v341_v29 = vmul.f32 %v179_v24, %v179_v24  ;;  %v459_v30 = vpack.c.bf16 %v211_v26, %v208_v19 }
  0xfa   :  { %476 = vst [vmem:[%s660_s2 + $0x8] sm:$0xff] %v444_v23   ;;  %480 = vst [vmem:[%s660_s2 + $0x28] sm:$0xff] %v464_v25   ;;  %v349_v2 = vmul.f32 %v211_v26, %v211_v26 }
  0xfb   :  { %440 = vst [vmem:[%s660_s2] sm:$0xff] %v439_v27   ;;  %v320_v32 = vadd.f32 %v517_v16, %v319_v28  ;;  %v356_v33 = vadd.f32 %v341_v29, %v340_v22  ;;  %479 = vst [vmem:[%s660_s2 + $0x20] sm:$0xff] %v459_v30  }
  0xfd   :  { %v357_v35 = vadd.f32 %v356_v33, %v342_v31  ;;  %v521_v36 = vpop.f32.mrb[4].mxu0  ;;  %v321_v37 = vadd.f32 %v518_v20, %v320_v32  ;;  %v529_v38 = vpop.f32.mrb[4].mxu1 }
  0xfe   :  { %v192_v39 = vpop.f32.mrb[5].mxu0  ;;  %v224_v40 = vpop.f32.mrb[5].mxu1  ;;  %v346_v55 = vmul.f32 %v521_v36, %v521_v36  ;;  %v354_v15 = vmul.f32 %v529_v38, %v529_v38 }
  0xff   :  { %v322_v41 = vadd.f32 %v321_v37, %v192_v39  ;;  %v344_v42 = vmul.f32 %v192_v39, %v192_v39  ;;  %v358_v43 = vadd.f32 %v357_v35, %v343_v34  ;;  %v522_v44 = vpop.f32.mrb[6].mxu0  ;;  %v530_v45 = vpop.f32.mrb[6].mxu1  ;;  %v352_v9 = vmul.f32 %v224_v40, %v224_v40 }
 0x100   :  { %v454_v46 = vpack.c.bf16 %v522_v44, %v521_v36  ;;  %v195_v47 = vpop.f32.mrb[7].mxu0  ;;  %v474_v48 = vpack.c.bf16 %v530_v45, %v529_v38  ;;  %v227_v49 = vpop.f32.mrb[7].mxu1  ;;  %v347_v58 = vmul.f32 %v522_v44, %v522_v44 }
 0x101   :  { %v359_v50 = vadd.f32 %v358_v43, %v344_v42  ;;  %v449_v51 = vpack.c.bf16 %v195_v47, %v192_v39  ;;  %v323_v52 = vadd.f32 %v322_v41, %v195_v47  ;;  %v345_v53 = vmul.f32 %v195_v47, %v195_v47 }
 0x102   :  { %478 = vst [vmem:[%s660_s2 + $0x18] sm:$0xff] %v454_v46   ;;  %482 = vst [vmem:[%s660_s2 + $0x38] sm:$0xff] %v474_v48   ;;  %v469_v54 = vpack.c.bf16 %v227_v49, %v224_v40  ;;  %v353_v14 = vmul.f32 %v227_v49, %v227_v49 }
 0x103   :  { %477 = vst [vmem:[%s660_s2 + $0x10] sm:$0xff] %v449_v51   ;;  %v324_v56 = vadd.f32 %v521_v36, %v323_v52  ;;  %v360_v57 = vadd.f32 %v359_v50, %v345_v53 }
 0x104   :  { %481 = vst [vmem:[%s660_s2 + $0x30] sm:$0xff] %v469_v54  }
 0x105   :  { %v361_v59 = vadd.f32 %v360_v57, %v346_v55  ;;  %v325_v60 = vadd.f32 %v522_v44, %v324_v56 }
 0x107   :  { %v326_v62 = vadd.f32 %v325_v60, %v208_v19  ;;  %v362_v63 = vadd.f32 %v361_v59, %v347_v58  ;;  %v355_v19 = vmul.f32 %v530_v45, %v530_v45 }
 0x109   :  { %v363_v0 = vadd.f32 %v362_v63, %v348_v61  ;;  %v327_v1 = vadd.f32 %v326_v62, %v211_v26 }
 0x10b   :  { %v328_v4 = vadd.f32 %v525_v17, %v327_v1  ;;  %v364_v5 = vadd.f32 %v363_v0, %v349_v2 }
 0x10d   :  { %v365_v7 = vadd.f32 %v364_v5, %v350_v3  ;;  %v329_v8 = vadd.f32 %v526_v21, %v328_v4 }
 0x10f   :  { %v330_v10 = vadd.f32 %v329_v8, %v224_v40  ;;  %v366_v11 = vadd.f32 %v365_v7, %v351_v6 }
 0x111   :  { %v367_v12 = vadd.f32 %v366_v11, %v352_v9  ;;  %v331_v13 = vadd.f32 %v330_v10, %v227_v49 }
 0x113   :  { %v332_v16 = vadd.f32 %v529_v38, %v331_v13  ;;  %v368_v18 = vadd.f32 %v367_v12, %v353_v14 }
 0x115   :  { %v333_v20 = vadd.f32 %v530_v45, %v332_v16  ;;  %v369_v22 = vadd.f32 %v368_v18, %v354_v15 }
 0x117   :  { %v334_v23 = vrot.slane %v333_v20, 4  ;;  %v370_v24 = vadd.f32 %v369_v22, %v355_v19 }
 0x119   :  { %v335_v25 = vadd.f32 %v334_v23, %v333_v20  ;;  %v371_v17 = vrot.slane %v370_v24, 4 }
 0x11b   :  { %v336_v26 = vrot.slane %v335_v25, 2  ;;  %v372_v27 = vadd.f32 %v371_v17, %v370_v24 }
 0x11d   :  { %v337_v28 = vadd.f32 %v336_v26, %v335_v25  ;;  %v373_v21 = vrot.slane %v372_v27, 2 }
 0x11f   :  { %v338_v29 = vrot.slane %v337_v28, 1  ;;  %v374_v30 = vadd.f32 %v373_v21, %v372_v27 }
 0x121   :  { %v375_v31 = vrot.slane %v374_v30, 1  ;;  %v339_v32 = vadd.f32 %v338_v29, %v337_v28 }
 0x123   :  { %v376_v33 = vadd.f32 %v375_v31, %v374_v30 }
 0x125   :  { %v378_v34 = vsel %vm377_vm0, %v339_v32, %v376_v33 }
 0x126   :  { %379 = vst [vmem:[%s661_s3] sm:$0x3] %v378_v34 }

// kernel: wrn_basic_block_forward.9
= control target key start
LH: loop header
LB: loop body
LE: loop exit
PB: predicated region body
PF: predicated region fallthrough
CT: control target
= control target key end

     0   :  { %s833_s3 = inlined_call_operand.vmem [shape: bf16[128,128], index: 3, kind: input, shape index: {}]   ;;  %s834_s1 = inlined_call_operand.vmem [shape: bf16[128,128], index: 1, kind: input, shape index: {}]   ;;  %s835_s2 = inlined_call_operand.vmem [shape: bf16[128,128], index: 2, kind: input, shape index: {}]   ;;  %s836_s0 = inlined_call_operand.vmem [shape: bf16[128,128], index: 0, kind: input, shape index: {}]   ;;  %s837_s4 = inlined_call_operand.vmem [shape: f32[128,128], index: 4, kind: output, shape index: {}]  }
   0x1   :  { %v632_v0 = vld [vmem:[%s833_s3] sm:$0xff]   ;;  %v634_v2 = vld [vmem:[%s833_s3 + $0x8] sm:$0xff]   ;;  %v636_v4 = vld [vmem:[%s833_s3 + $0x10] sm:$0xff]  }
   0x2   :  { %v633_v1 = vld [vmem:[%s834_s1] sm:$0xff]   ;;  %552 = vmatprep.subr.bf16.mxu1 %v632_v0  ;;  %v635_v3 = vld [vmem:[%s834_s1 + $0x8] sm:$0xff]   ;;  %v637_v5 = vld [vmem:[%s834_s1 + $0x10] sm:$0xff]  }
   0x3   :  { %584 = vmatprep.subr.bf16.mxu0 %v633_v1  ;;  %553 = vmatpush3.bf16.msra.mxu1 %v632_v0  ;;  %v638_v6 = vld [vmem:[%s833_s3 + $0x18] sm:$0xff]   ;;  %v640_v8 = vld [vmem:[%s833_s3 + $0x20] sm:$0xff]   ;;  %v642_v10 = vld [vmem:[%s833_s3 + $0x28] sm:$0xff]  }
   0x4   :  { %585 = vmatpush3.bf16.msra.mxu0 %v633_v1  ;;  %554 = vmatprep.subr.bf16.mxu1 %v634_v2  ;;  %v639_v7 = vld [vmem:[%s834_s1 + $0x18] sm:$0xff]   ;;  %v641_v9 = vld [vmem:[%s834_s1 + $0x20] sm:$0xff]   ;;  %v643_v11 = vld [vmem:[%s834_s1 + $0x28] sm:$0xff]  }
   0x5   :  { %586 = vmatprep.subr.bf16.mxu0 %v635_v3  ;;  %v648_v12 = vld [vmem:[%s835_s2] sm:$0xff]   ;;  %v644_v14 = vld [vmem:[%s833_s3 + $0x30] sm:$0xff]   ;;  %v646_v16 = vld [vmem:[%s833_s3 + $0x38] sm:$0xff]  }
   0x6   :  { %v649_v13 = vld [vmem:[%s836_s0] sm:$0xff]   ;;  %568 = vmatprep.mubr.bf16.mxu1 %v648_v12  ;;  %v645_v15 = vld [vmem:[%s834_s1 + $0x30] sm:$0xff]   ;;  %v647_v17 = vld [vmem:[%s834_s1 + $0x38] sm:$0xff]  }
   0x7   :  { %555 = vmatpush3.bf16.msra.mxu1 %v634_v2  ;;  %600 = vmatprep.mubr.bf16.mxu0 %v649_v13  ;;  %v650_v18 = vld [vmem:[%s835_s2 + $0x8] sm:$0xff]   ;;  %v652_v20 = vld [vmem:[%s835_s2 + $0x10] sm:$0xff]   ;;  %v654_v22 = vld [vmem:[%s835_s2 + $0x18] sm:$0xff]  }
   0x8   :  { %587 = vmatpush3.bf16.msra.mxu0 %v635_v3  ;;  %556 = vmatprep.subr.bf16.mxu1 %v636_v4  ;;  %v651_v19 = vld [vmem:[%s836_s0 + $0x8] sm:$0xff]   ;;  %v653_v21 = vld [vmem:[%s836_s0 + $0x10] sm:$0xff]   ;;  %v655_v23 = vld [vmem:[%s836_s0 + $0x18] sm:$0xff]  }
   0x9   :  { %588 = vmatprep.subr.bf16.mxu0 %v637_v5  ;;  %v656_v24 = vld [vmem:[%s835_s2 + $0x20] sm:$0xff]   ;;  %v658_v26 = vld [vmem:[%s835_s2 + $0x28] sm:$0xff]   ;;  %v660_v28 = vld [vmem:[%s835_s2 + $0x30] sm:$0xff]  }
   0xa   :  { %v657_v25 = vld [vmem:[%s836_s0 + $0x20] sm:$0xff]   ;;  %v659_v27 = vld [vmem:[%s836_s0 + $0x28] sm:$0xff]   ;;  %v661_v29 = vld [vmem:[%s836_s0 + $0x30] sm:$0xff]  }
   0xb   :  { %557 = vmatpush3.bf16.msra.mxu1 %v636_v4  ;;  %v662_v30 = vld [vmem:[%s835_s2 + $0x38] sm:$0xff]  }
   0xc   :  { %589 = vmatpush3.bf16.msra.mxu0 %v637_v5  ;;  %558 = vmatprep.subr.bf16.mxu1 %v638_v6  ;;  %v663_v31 = vld [vmem:[%s836_s0 + $0x38] sm:$0xff]  }
   0xd   :  { %590 = vmatprep.subr.bf16.mxu0 %v639_v7 }
   0xf   :  { %559 = vmatpush3.bf16.msra.mxu1 %v638_v6 }
  0x10   :  { %591 = vmatpush3.bf16.msra.mxu0 %v639_v7  ;;  %560 = vmatprep.subr.bf16.mxu1 %v640_v8 }
  0x11   :  { %592 = vmatprep.subr.bf16.mxu0 %v641_v9 }
  0x13   :  { %561 = vmatpush3.bf16.msra.mxu1 %v640_v8 }
  0x14   :  { %593 = vmatpush3.bf16.msra.mxu0 %v641_v9  ;;  %562 = vmatprep.subr.bf16.mxu1 %v642_v10 }
  0x15   :  { %594 = vmatprep.subr.bf16.mxu0 %v643_v11 }
  0x17   :  { %563 = vmatpush3.bf16.msra.mxu1 %v642_v10 }
  0x18   :  { %595 = vmatpush3.bf16.msra.mxu0 %v643_v11  ;;  %564 = vmatprep.subr.bf16.mxu1 %v644_v14 }
  0x19   :  { %596 = vmatprep.subr.bf16.mxu0 %v645_v15 }
  0x1b   :  { %565 = vmatpush3.bf16.msra.mxu1 %v644_v14 }
  0x1c   :  { %597 = vmatpush3.bf16.msra.mxu0 %v645_v15  ;;  %566 = vmatprep.subr.bf16.mxu1 %v646_v16 }
  0x1d   :  { %598 = vmatprep.subr.bf16.mxu0 %v647_v17 }
  0x1f   :  { %567 = vmatpush3.bf16.msra.mxu1 %v646_v16 }
  0x20   :  { %599 = vmatpush3.bf16.msra.mxu0 %v647_v17 }
  0x22   :  { %569 = vmatmul.mubr.bf16.vlgmr.msra.gmra.mrb[0].mxu1 %v650_v18 }
  0x23   :  { %601 = vmatmul.mubr.bf16.vlgmr.msra.gmra.mrb[0].mxu0 %v651_v19  ;;  %572 = vmatprep.mubr.bf16.mxu1 %v652_v20 }
  0x24   :  { %604 = vmatprep.mubr.bf16.mxu0 %v653_v21 }
  0x2a   :  { %573 = vmatmul.mubr.bf16.gmra.mrb[4].mxu1 %v654_v22 }
  0x2b   :  { %605 = vmatmul.mubr.bf16.gmra.mrb[4].mxu0 %v655_v23  ;;  %576 = vmatprep.mubr.bf16.mxu1 %v656_v24 }
  0x2c   :  { %608 = vmatprep.mubr.bf16.mxu0 %v657_v25 }
  0x32   :  { %577 = vmatmul.mubr.bf16.gmra.mrb[8].mxu1 %v658_v26 }
  0x33   :  { %609 = vmatmul.mubr.bf16.gmra.mrb[8].mxu0 %v659_v27  ;;  %580 = vmatprep.mubr.bf16.mxu1 %v660_v28 }
  0x34   :  { %612 = vmatprep.mubr.bf16.mxu0 %v661_v29 }
  0x3a   :  { %581 = vmatmul.mubr.bf16.gmra.mrb[12].mxu1 %v662_v30 }
  0x3b   :  { %613 = vmatmul.mubr.bf16.gmra.mrb[12].mxu0 %v663_v31 }
  0xf5   :  { %v570_v32 = vpop.f32.mrb[0].mxu1 }
  0xf6   :  { %v602_v33 = vpop.f32.mrb[0].mxu0  ;;  %v180_v34 = vpop.f32.mrb[1].mxu1 }
  0xf7   :  { %v414_v35 = vadd.f32 %v602_v33, %v570_v32  ;;  %v405_v36 = vpop.f32.mrb[1].mxu0  ;;  %v571_v37 = vpop.f32.mrb[2].mxu1 }
  0xf8   :  { %v406_v38 = vadd.f32 %v405_v36, %v180_v34  ;;  %v603_v39 = vpop.f32.mrb[2].mxu0  ;;  %v183_v40 = vpop.f32.mrb[3].mxu1 }
  0xf9   :  { %470 = vst [vmem:[%s837_s4 + $0x10] sm:$0xff] %v414_v35  ;;  %v417_v41 = vadd.f32 %v603_v39, %v571_v37  ;;  %v408_v42 = vpop.f32.mrb[3].mxu0 }
  0xfa   :  { %468 = vst [vmem:[%s837_s4] sm:$0xff] %v406_v38  ;;  %v409_v43 = vadd.f32 %v408_v42, %v183_v40 }
  0xfb   :  { %471 = vst [vmem:[%s837_s4 + $0x18] sm:$0xff] %v417_v41 }
  0xfc   :  { %469 = vst [vmem:[%s837_s4 + $0x8] sm:$0xff] %v409_v43 }
  0xfd   :  { %v574_v44 = vpop.f32.mrb[4].mxu1 }
  0xfe   :  { %v606_v45 = vpop.f32.mrb[4].mxu0  ;;  %v196_v46 = vpop.f32.mrb[5].mxu1 }
  0xff   :  { %v430_v47 = vadd.f32 %v606_v45, %v574_v44  ;;  %v421_v48 = vpop.f32.mrb[5].mxu0  ;;  %v575_v49 = vpop.f32.mrb[6].mxu1 }
 0x100   :  { %v422_v50 = vadd.f32 %v421_v48, %v196_v46  ;;  %v607_v51 = vpop.f32.mrb[6].mxu0  ;;  %v199_v52 = vpop.f32.mrb[7].mxu1 }
 0x101   :  { %474 = vst [vmem:[%s837_s4 + $0x30] sm:$0xff] %v430_v47  ;;  %v433_v53 = vadd.f32 %v607_v51, %v575_v49  ;;  %v424_v54 = vpop.f32.mrb[7].mxu0 }
 0x102   :  { %472 = vst [vmem:[%s837_s4 + $0x20] sm:$0xff] %v422_v50  ;;  %v425_v55 = vadd.f32 %v424_v54, %v199_v52 }
 0x103   :  { %475 = vst [vmem:[%s837_s4 + $0x38] sm:$0xff] %v433_v53 }
 0x104   :  { %473 = vst [vmem:[%s837_s4 + $0x28] sm:$0xff] %v425_v55 }
 0x105   :  { %v578_v56 = vpop.f32.mrb[8].mxu1 }
 0x106   :  { %v610_v57 = vpop.f32.mrb[8].mxu0  ;;  %v212_v58 = vpop.f32.mrb[9].mxu1 }
 0x107   :  { %v446_v59 = vadd.f32 %v610_v57, %v578_v56  ;;  %v437_v60 = vpop.f32.mrb[9].mxu0  ;;  %v579_v61 = vpop.f32.mrb[10].mxu1 }
 0x108   :  { %v438_v62 = vadd.f32 %v437_v60, %v212_v58  ;;  %v611_v63 = vpop.f32.mrb[10].mxu0  ;;  %v215_v0 = vpop.f32.mrb[11].mxu1 }
 0x109   :  { %478 = vst [vmem:[%s837_s4 + $0x50] sm:$0xff] %v446_v59  ;;  %v449_v1 = vadd.f32 %v611_v63, %v579_v61  ;;  %v440_v2 = vpop.f32.mrb[11].mxu0 }
 0x10a   :  { %476 = vst [vmem:[%s837_s4 + $0x40] sm:$0xff] %v438_v62  ;;  %v441_v3 = vadd.f32 %v440_v2, %v215_v0 }
 0x10b   :  { %479 = vst [vmem:[%s837_s4 + $0x58] sm:$0xff] %v449_v1 }
 0x10c   :  { %477 = vst [vmem:[%s837_s4 + $0x48] sm:$0xff] %v441_v3 }
 0x10d   :  { %v582_v4 = vpop.f32.mrb[12].mxu1 }
 0x10e   :  { %v614_v5 = vpop.f32.mrb[12].mxu0  ;;  %v228_v6 = vpop.f32.mrb[13].mxu1 }
 0x10f   :  { %v462_v7 = vadd.f32 %v614_v5, %v582_v4  ;;  %v453_v8 = vpop.f32.mrb[13].mxu0  ;;  %v583_v9 = vpop.f32.mrb[14].mxu1 }
 0x110   :  { %v454_v10 = vadd.f32 %v453_v8, %v228_v6  ;;  %v615_v11 = vpop.f32.mrb[14].mxu0  ;;  %v231_v12 = vpop.f32.mrb[15].mxu1 }
 0x111   :  { %482 = vst [vmem:[%s837_s4 + $0x70] sm:$0xff] %v462_v7  ;;  %v465_v13 = vadd.f32 %v615_v11, %v583_v9  ;;  %v456_v14 = vpop.f32.mrb[15].mxu0 }
 0x112   :  { %480 = vst [vmem:[%s837_s4 + $0x60] sm:$0xff] %v454_v10  ;;  %v457_v15 = vadd.f32 %v456_v14, %v231_v12 }
 0x113   :  { %483 = vst [vmem:[%s837_s4 + $0x78] sm:$0xff] %v465_v13 }
 0x114   :  { %481 = vst [vmem:[%s837_s4 + $0x68] sm:$0xff] %v457_v15 }

</bundles_post_ra>
